<compile_context>
chip_gen: v5e
topology: v5e:2x2
jax: 0.10.0
libtpu: 0.0.40
codegen_flags: <defaults>
</compile_context>

<pallas_src>
import jax
import jax.numpy as jnp
import numpy as np
from jax.experimental import pallas as pl
from jax.experimental.pallas import tpu as pltpu

# ----- Hyper-parameters (small shapes consistent with the module's __init__) -----
VOCAB = 50
OUT_DIM = 4                                  # output_size
EMB = 32                                     # embedding_dim
N_MAPS, K, STRIDE, PAD = 32, 3, 1, 1         # cnn_params for nn.Conv1d
POOL_K, POOL_STRIDE, POOL_PAD = 2, 2, 0      # pool_params for nn.MaxPool1d
HID = 32                                     # hidden_dim
N_LAYERS = 2
BATCH = 2
SEQ = 16

L_PADDED = SEQ + 2 * PAD                                  # 18
L_CONV = (SEQ + 2 * PAD - K) // STRIDE + 1                # 16
T = (L_CONV + 2 * POOL_PAD - POOL_K) // POOL_STRIDE + 1   # 8 (down-sampled seq)

assert STRIDE == 1 and POOL_PAD == 0 and POOL_K == POOL_STRIDE
assert N_MAPS == HID          # lets us stack per-layer LSTM input weights
assert L_CONV == T * POOL_K   # pooling covers conv output exactly


def _lstm_cell(gates, c_prev):
    """PyTorch LSTM cell update from pre-activation gates (order i, f, g, o)."""
    sg = jax.nn.sigmoid(gates)                 # full 128-wide EUP op, slice after
    i = sg[:, 0 * HID:1 * HID]
    f = sg[:, 1 * HID:2 * HID]
    o = sg[:, 3 * HID:4 * HID]
    g = jnp.tanh(gates[:, 2 * HID:3 * HID])
    c_new = f * c_prev + i * g
    h_new = o * jnp.tanh(c_new)
    return h_new, c_new


# --------------------------- Fully fused forward kernel ---------------------------
def fused_kernel(tok_ref, emb_ref, cw_ref, cb_ref, h0_ref, c0_ref,
                 wih_ref, whh_ref, b_ref, fcw_ref, fcb_ref,
                 out_ref, hn_ref, cn_ref):
    # ---- Embedding lookup as a one-hot matmul (gather-free, MXU-friendly) ----
    tok = tok_ref[...]                                                   # (B, SEQ) int32
    iota_v = jax.lax.broadcasted_iota(jnp.int32, (BATCH, SEQ, VOCAB), 2)
    onehot = (tok[:, :, None] == iota_v).astype(jnp.float32)             # (B, SEQ, V)
    emb_tab = emb_ref[...]                                               # (V, EMB)

    # ---- Conv1d(pad=1) via im2col: fold batch and taps into one matmul ----
    zrow = jnp.zeros((PAD, EMB), jnp.float32)
    ims = []
    for b in range(BATCH):                                               # static, B=2
        emb_b = jnp.dot(onehot[b], emb_tab,
                        preferred_element_type=jnp.float32)              # (SEQ, EMB)
        xpad = jnp.concatenate([zrow, emb_b, zrow], axis=0)              # (L_PADDED, EMB)
        ims.append(jnp.concatenate([xpad[k:k + L_CONV, :] for k in range(K)],
                                   axis=1))                              # (L_CONV, K*EMB)
    im = jnp.concatenate(ims, axis=0)                                    # (B*L_CONV, K*EMB)
    conv = jnp.maximum(
        jnp.dot(im, cw_ref[...], preferred_element_type=jnp.float32) + cb_ref[...],
        0.0)                                                             # (B*L_CONV, C)

    # ---- MaxPool1d(kernel=2, stride=2): reshape + elementwise max ----
    r = conv.reshape(BATCH * T, POOL_K, N_MAPS)
    pooled = jnp.maximum(r[:, 0, :], r[:, 1, :])                         # (B*T, C), row = b*T+t

    # ---- Stacked LSTM (batch_first); layer-0 input projection hoisted ----
    xw0 = (jnp.dot(pooled, wih_ref[0], preferred_element_type=jnp.float32)
           + b_ref[0])                                                   # (B*T, 4H)

    h = [h0_ref[l] for l in range(N_LAYERS)]                             # each (B, H)
    c = [c0_ref[l] for l in range(N_LAYERS)]
    for t in range(T):                                                   # static unroll
        x_in = jnp.concatenate(
            [xw0[b * T + t:b * T + t + 1, :] for b in range(BATCH)], axis=0)  # (B, 4H)
        for l in range(N_LAYERS):
            if l > 0:
                x_in = (jnp.dot(h[l - 1], wih_ref[l],
                                preferred_element_type=jnp.float32) + b_ref[l])
            gates = x_in + jnp.dot(h[l], whh_ref[l],
                                   preferred_element_type=jnp.float32)
            h[l], c[l] = _lstm_cell(gates, c[l])

    # ---- Dropout(p=0) is identity; FC only on the last timestep (all that's used) ----
    # TODO(synk): nn.Dropout(p_dropout) with p>0 / train mode would need in-kernel PRNG.
    out_ref[...] = (jnp.dot(h[N_LAYERS - 1], fcw_ref[...],
                            preferred_element_type=jnp.float32) + fcb_ref[...])
    for l in range(N_LAYERS):
        hn_ref[l] = h[l]
        cn_ref[l] = c[l]


def fused_forward(tokens, emb, conv_w_flat, conv_b, h0, c0, wih_t, whh_t, bias,
                  fc_w_t, fc_b):
    full = lambda shape: pl.BlockSpec(shape, lambda i: (0,) * len(shape))
    return pl.pallas_call(
        fused_kernel,
        out_shape=(jax.ShapeDtypeStruct((BATCH, OUT_DIM), jnp.float32),
                   jax.ShapeDtypeStruct((N_LAYERS, BATCH, HID), jnp.float32),
                   jax.ShapeDtypeStruct((N_LAYERS, BATCH, HID), jnp.float32)),
        grid_spec=pltpu.PrefetchScalarGridSpec(
            num_scalar_prefetch=0, grid=(1,),
            in_specs=[
                full((BATCH, SEQ)),                      # tokens (int32)
                full((VOCAB, EMB)),                      # embedding table
                full((K * EMB, N_MAPS)),                 # im2col conv weight
                full((1, N_MAPS)),                       # conv bias
                full((N_LAYERS, BATCH, HID)),            # h0
                full((N_LAYERS, BATCH, HID)),            # c0
                full((N_LAYERS, N_MAPS, 4 * HID)),       # W_ih (transposed)
                full((N_LAYERS, HID, 4 * HID)),          # W_hh (transposed)
                full((N_LAYERS, 1, 4 * HID)),            # b_ih + b_hh
                full((HID, OUT_DIM)),                    # fc weight (transposed)
                full((1, OUT_DIM)),                      # fc bias
            ],
            out_specs=(full((BATCH, OUT_DIM)),
                       full((N_LAYERS, BATCH, HID)),
                       full((N_LAYERS, BATCH, HID))),
        ),
        compiler_params=pltpu.CompilerParams(dimension_semantics=("arbitrary",)),
    )(tokens, emb, conv_w_flat, conv_b, h0, c0, wih_t, whh_t, bias, fc_w_t, fc_b)


# ------------------------------- Full forward (wrapper) -------------------------------
def hate_speech_forward(tokens, params, hidden):
    h0, c0 = hidden
    # Weight re-layouts (would be precomputed once in a real deployment):
    # conv_w (C, E, K) -> (K, E, C) -> (K*E, C) so row order matches the im2col rows.
    conv_w_flat = jnp.transpose(params["conv_w"], (2, 1, 0)).reshape(K * EMB, N_MAPS)
    wih_t = jnp.transpose(params["w_ih"], (0, 2, 1))               # (L, C, 4H)
    whh_t = jnp.transpose(params["w_hh"], (0, 2, 1))               # (L, H, 4H)
    bias = (params["b_ih"] + params["b_hh"])[:, None, :]           # (L, 1, 4H)
    out, h_n, c_n = fused_forward(
        tokens, params["emb"], conv_w_flat, params["conv_b"][None, :],
        h0, c0, wih_t, whh_t, bias, params["fc_w"].T, params["fc_b"][None, :])
    return out, (h_n, c_n)


# --------------------------------- Pure-JAX reference ---------------------------------
def ref_forward(tokens, params, hidden):
    h0, c0 = hidden
    emb = params["emb"][tokens]
    x = jnp.transpose(emb, (0, 2, 1))                              # (B, E, SEQ) — NCL
    x = jnp.pad(x, ((0, 0), (0, 0), (PAD, PAD)))
    cols = [jnp.einsum("bek,cek->bc", x[:, :, t:t + K], params["conv_w"])
            + params["conv_b"] for t in range(L_CONV)]
    conv = jnp.stack(cols, axis=-1)                                # (B, C, L_CONV)
    relu = jnp.maximum(conv, 0.0)
    pooled = jnp.stack([jnp.max(relu[:, :, j * POOL_STRIDE:j * POOL_STRIDE + POOL_K],
                                axis=-1) for j in range(T)], axis=-1)
    seq = jnp.transpose(pooled, (0, 2, 1))                         # (B, T, C)
    h = [h0[l] for l in range(N_LAYERS)]
    c = [c0[l] for l in range(N_LAYERS)]
    outs = []
    for t in range(T):
        inp = seq[:, t, :]
        for l in range(N_LAYERS):
            gates = (inp @ params["w_ih"][l].T + h[l] @ params["w_hh"][l].T
                     + params["b_ih"][l] + params["b_hh"][l])
            i = jax.nn.sigmoid(gates[:, :HID])
            f = jax.nn.sigmoid(gates[:, HID:2 * HID])
            g = jnp.tanh(gates[:, 2 * HID:3 * HID])
            o = jax.nn.sigmoid(gates[:, 3 * HID:])
            c[l] = f * c[l] + i * g
            h[l] = o * jnp.tanh(c[l])
            inp = h[l]
        outs.append(inp)
    lstm_out = jnp.stack(outs, axis=1).reshape(-1, HID)
    fc = lstm_out @ params["fc_w"].T + params["fc_b"]
    out = fc.reshape(BATCH, -1, OUT_DIM)[:, -1]
    return out, (jnp.stack(h), jnp.stack(c))


if __name__ == "__main__":
    key = jax.random.PRNGKey(0)
    ks = jax.random.split(key, 10)
    params = {
        "emb":    jax.random.normal(ks[0], (VOCAB, EMB), jnp.float32) * 0.1,
        "conv_w": jax.random.normal(ks[1], (N_MAPS, EMB, K), jnp.float32) * 0.1,
        "conv_b": jax.random.normal(ks[2], (N_MAPS,), jnp.float32) * 0.1,
        "w_ih":   jax.random.normal(ks[3], (N_LAYERS, 4 * HID, HID), jnp.float32) * 0.1,
        "w_hh":   jax.random.normal(ks[4], (N_LAYERS, 4 * HID, HID), jnp.float32) * 0.1,
        "b_ih":   jax.random.normal(ks[5], (N_LAYERS, 4 * HID), jnp.float32) * 0.1,
        "b_hh":   jax.random.normal(ks[6], (N_LAYERS, 4 * HID), jnp.float32) * 0.1,
        "fc_w":   jax.random.normal(ks[7], (OUT_DIM, HID), jnp.float32) * 0.1,
        "fc_b":   jax.random.normal(ks[8], (OUT_DIM,), jnp.float32) * 0.1,
    }
    tokens = jax.random.randint(ks[9], (BATCH, SEQ), 0, VOCAB, dtype=jnp.int32)
    h0 = jnp.zeros((N_LAYERS, BATCH, HID), jnp.float32)   # init_hidden()
    c0 = jnp.zeros((N_LAYERS, BATCH, HID), jnp.float32)

    out, (h_n, c_n) = hate_speech_forward(tokens, params, (h0, c0))
    jax.block_until_ready((out, h_n, c_n))

    out_r, (h_r, c_r) = ref_forward(tokens, params, (h0, c0))
    np.testing.assert_allclose(np.asarray(out), np.asarray(out_r), rtol=2e-4, atol=1e-5)
    np.testing.assert_allclose(np.asarray(h_n), np.asarray(h_r), rtol=2e-4, atol=1e-5)
    np.testing.assert_allclose(np.asarray(c_n), np.asarray(c_r), rtol=2e-4, atol=1e-5)

    print("KERNEL_OK")
</pallas_src>

<mosaic_0001>
module attributes {stable_mosaic.version = 11 : i64} {
  func.func @fused_kernel(%arg0: i32, %arg1: memref<2x16xi32, #tpu.memory_space<vmem>>, %arg2: memref<50x32xf32, #tpu.memory_space<vmem>>, %arg3: memref<96x32xf32, #tpu.memory_space<vmem>>, %arg4: memref<1x32xf32, #tpu.memory_space<vmem>>, %arg5: memref<2x2x32xf32, #tpu.memory_space<vmem>>, %arg6: memref<2x2x32xf32, #tpu.memory_space<vmem>>, %arg7: memref<2x32x128xf32, #tpu.memory_space<vmem>>, %arg8: memref<2x32x128xf32, #tpu.memory_space<vmem>>, %arg9: memref<2x1x128xf32, #tpu.memory_space<vmem>>, %arg10: memref<32x4xf32, #tpu.memory_space<vmem>>, %arg11: memref<1x4xf32, #tpu.memory_space<vmem>>, %arg12: memref<2x4xf32, #tpu.memory_space<vmem>>, %arg13: memref<2x2x32xf32, #tpu.memory_space<vmem>>, %arg14: memref<2x2x32xf32, #tpu.memory_space<vmem>>) attributes {dimension_semantics = [#tpu.dimension_semantics<arbitrary>], iteration_bounds = array<i64: 1>, scalar_prefetch = 0 : i64, scratch_operands = 0 : i64, tpu.core_type = #tpu.core_type<tc>, window_params = [{pipeline_mode = #tpu.pipeline_mode<synchronous>, transform_indices = @transform_0, window_bounds = array<i64: 2, 16>}, {pipeline_mode = #tpu.pipeline_mode<synchronous>, transform_indices = @transform_1, window_bounds = array<i64: 50, 32>}, {pipeline_mode = #tpu.pipeline_mode<synchronous>, transform_indices = @transform_2, window_bounds = array<i64: 96, 32>}, {pipeline_mode = #tpu.pipeline_mode<synchronous>, transform_indices = @transform_3, window_bounds = array<i64: 1, 32>}, {pipeline_mode = #tpu.pipeline_mode<synchronous>, transform_indices = @transform_4, window_bounds = array<i64: 2, 2, 32>}, {pipeline_mode = #tpu.pipeline_mode<synchronous>, transform_indices = @transform_5, window_bounds = array<i64: 2, 2, 32>}, {pipeline_mode = #tpu.pipeline_mode<synchronous>, transform_indices = @transform_6, window_bounds = array<i64: 2, 32, 128>}, {pipeline_mode = #tpu.pipeline_mode<synchronous>, transform_indices = @transform_7, window_bounds = array<i64: 2, 32, 128>}, {pipeline_mode = #tpu.pipeline_mode<synchronous>, transform_indices = @transform_8, window_bounds = array<i64: 2, 1, 128>}, {pipeline_mode = #tpu.pipeline_mode<synchronous>, transform_indices = @transform_9, window_bounds = array<i64: 32, 4>}, {pipeline_mode = #tpu.pipeline_mode<synchronous>, transform_indices = @transform_10, window_bounds = array<i64: 1, 4>}, {pipeline_mode = #tpu.pipeline_mode<synchronous>, transform_indices = @transform_11, window_bounds = array<i64: 2, 4>}, {pipeline_mode = #tpu.pipeline_mode<synchronous>, transform_indices = @transform_12, window_bounds = array<i64: 2, 2, 32>}, {pipeline_mode = #tpu.pipeline_mode<synchronous>, transform_indices = @transform_13, window_bounds = array<i64: 2, 2, 32>}]} {
    %c0 = arith.constant 0 : index
    %c0_0 = arith.constant 0 : index
    %0 = vector.load %arg1[%c0, %c0_0] : memref<2x16xi32, #tpu.memory_space<vmem>>, vector<2x16xi32>
    %1 = tpu.iota {dimensions = array<i32: 2>} : vector<2x16x50xi32>
    %2 = vector.shape_cast %0 : vector<2x16xi32> to vector<2x16x1xi32>
    %3 = vector.broadcast %2 : vector<2x16x1xi32> to vector<2x16x50xi32>
    %4 = arith.cmpi eq, %3, %1 : vector<2x16x50xi32>
    %5 = arith.extui %4 : vector<2x16x50xi1> to vector<2x16x50xi32>
    %6 = arith.sitofp %5 : vector<2x16x50xi32> to vector<2x16x50xf32>
    %c0_1 = arith.constant 0 : index
    %c0_2 = arith.constant 0 : index
    %7 = vector.load %arg2[%c0_1, %c0_2] : memref<50x32xf32, #tpu.memory_space<vmem>>, vector<50x32xf32>
    %cst = arith.constant 0.000000e+00 : f32
    %8 = vector.broadcast %cst : f32 to vector<1x32xf32>
    %9 = vector.extract_strided_slice %6 {offsets = [0, 0, 0], sizes = [1, 16, 50], strides = [1, 1, 1]} : vector<2x16x50xf32> to vector<1x16x50xf32>
    %10 = vector.shape_cast %9 : vector<1x16x50xf32> to vector<16x50xf32>
    %cst_3 = arith.constant dense<0.000000e+00> : vector<16x32xf32>
    %11 = tpu.matmul %10, %7, %cst_3 {dimension_numbers = #tpu.dot_dimension_numbers<[1], [0], [0], [1], [0, 0, 1, 1], [], []>} : vector<16x50xf32>, vector<50x32xf32>, vector<16x32xf32> -> vector<16x32xf32>
    %12 = tpu.concatenate %8, %11, %8 in 0 : vector<1x32xf32>, vector<16x32xf32>, vector<1x32xf32> -> vector<18x32xf32>
    %13 = vector.extract_strided_slice %12 {offsets = [0, 0], sizes = [16, 32], strides = [1, 1]} : vector<18x32xf32> to vector<16x32xf32>
    %14 = vector.extract_strided_slice %12 {offsets = [1, 0], sizes = [16, 32], strides = [1, 1]} : vector<18x32xf32> to vector<16x32xf32>
    %15 = vector.extract_strided_slice %12 {offsets = [2, 0], sizes = [16, 32], strides = [1, 1]} : vector<18x32xf32> to vector<16x32xf32>
    %16 = tpu.concatenate %13, %14, %15 in 1 : vector<16x32xf32>, vector<16x32xf32>, vector<16x32xf32> -> vector<16x96xf32>
    %17 = vector.extract_strided_slice %6 {offsets = [1, 0, 0], sizes = [1, 16, 50], strides = [1, 1, 1]} : vector<2x16x50xf32> to vector<1x16x50xf32>
    %18 = vector.shape_cast %17 : vector<1x16x50xf32> to vector<16x50xf32>
    %cst_4 = arith.constant dense<0.000000e+00> : vector<16x32xf32>
    %19 = tpu.matmul %18, %7, %cst_4 {dimension_numbers = #tpu.dot_dimension_numbers<[1], [0], [0], [1], [0, 0, 1, 1], [], []>} : vector<16x50xf32>, vector<50x32xf32>, vector<16x32xf32> -> vector<16x32xf32>
    %20 = tpu.concatenate %8, %19, %8 in 0 : vector<1x32xf32>, vector<16x32xf32>, vector<1x32xf32> -> vector<18x32xf32>
    %21 = vector.extract_strided_slice %20 {offsets = [0, 0], sizes = [16, 32], strides = [1, 1]} : vector<18x32xf32> to vector<16x32xf32>
    %22 = vector.extract_strided_slice %20 {offsets = [1, 0], sizes = [16, 32], strides = [1, 1]} : vector<18x32xf32> to vector<16x32xf32>
    %23 = vector.extract_strided_slice %20 {offsets = [2, 0], sizes = [16, 32], strides = [1, 1]} : vector<18x32xf32> to vector<16x32xf32>
    %24 = tpu.concatenate %21, %22, %23 in 1 : vector<16x32xf32>, vector<16x32xf32>, vector<16x32xf32> -> vector<16x96xf32>
    %25 = tpu.concatenate %16, %24 in 0 : vector<16x96xf32>, vector<16x96xf32> -> vector<32x96xf32>
    %c0_5 = arith.constant 0 : index
    %c0_6 = arith.constant 0 : index
    %26 = vector.load %arg3[%c0_5, %c0_6] : memref<96x32xf32, #tpu.memory_space<vmem>>, vector<96x32xf32>
    %cst_7 = arith.constant dense<0.000000e+00> : vector<32x32xf32>
    %27 = tpu.matmul %25, %26, %cst_7 {dimension_numbers = #tpu.dot_dimension_numbers<[1], [0], [0], [1], [0, 0, 1, 1], [], []>} : vector<32x96xf32>, vector<96x32xf32>, vector<32x32xf32> -> vector<32x32xf32>
    %c0_8 = arith.constant 0 : index
    %c0_9 = arith.constant 0 : index
    %28 = vector.load %arg4[%c0_8, %c0_9] : memref<1x32xf32, #tpu.memory_space<vmem>>, vector<1x32xf32>
    %29 = vector.broadcast %28 : vector<1x32xf32> to vector<32x32xf32>
    %30 = arith.addf %27, %29 : vector<32x32xf32>
    %cst_10 = arith.constant 0.000000e+00 : f32
    %31 = vector.broadcast %cst_10 : f32 to vector<32x32xf32>
    %32 = arith.maximumf %30, %31 : vector<32x32xf32>
    %33 = vector.shape_cast %32 : vector<32x32xf32> to vector<16x2x32xf32>
    %34 = vector.extract_strided_slice %33 {offsets = [0, 0, 0], sizes = [16, 1, 32], strides = [1, 1, 1]} : vector<16x2x32xf32> to vector<16x1x32xf32>
    %35 = vector.shape_cast %34 : vector<16x1x32xf32> to vector<16x32xf32>
    %36 = vector.extract_strided_slice %33 {offsets = [0, 1, 0], sizes = [16, 1, 32], strides = [1, 1, 1]} : vector<16x2x32xf32> to vector<16x1x32xf32>
    %37 = vector.shape_cast %36 : vector<16x1x32xf32> to vector<16x32xf32>
    %38 = arith.maximumf %35, %37 : vector<16x32xf32>
    %c0_11 = arith.constant 0 : index
    %c0_12 = arith.constant 0 : index
    %c0_13 = arith.constant 0 : index
    %39 = vector.load %arg7[%c0_11, %c0_12, %c0_13] : memref<2x32x128xf32, #tpu.memory_space<vmem>>, vector<1x32x128xf32>
    %40 = vector.shape_cast %39 : vector<1x32x128xf32> to vector<32x128xf32>
    %cst_14 = arith.constant dense<0.000000e+00> : vector<16x128xf32>
    %41 = tpu.matmul %38, %40, %cst_14 {dimension_numbers = #tpu.dot_dimension_numbers<[1], [0], [0], [1], [0, 0, 1, 1], [], []>} : vector<16x32xf32>, vector<32x128xf32>, vector<16x128xf32> -> vector<16x128xf32>
    %c0_15 = arith.constant 0 : index
    %c0_16 = arith.constant 0 : index
    %c0_17 = arith.constant 0 : index
    %42 = vector.load %arg9[%c0_15, %c0_16, %c0_17] : memref<2x1x128xf32, #tpu.memory_space<vmem>>, vector<1x1x128xf32>
    %43 = vector.shape_cast %42 : vector<1x1x128xf32> to vector<1x128xf32>
    %44 = vector.broadcast %43 : vector<1x128xf32> to vector<16x128xf32>
    %45 = arith.addf %41, %44 : vector<16x128xf32>
    %c0_18 = arith.constant 0 : index
    %c0_19 = arith.constant 0 : index
    %c0_20 = arith.constant 0 : index
    %46 = vector.load %arg5[%c0_18, %c0_19, %c0_20] : memref<2x2x32xf32, #tpu.memory_space<vmem>>, vector<1x2x32xf32>
    %47 = vector.shape_cast %46 : vector<1x2x32xf32> to vector<2x32xf32>
    %c1 = arith.constant 1 : index
    %c0_21 = arith.constant 0 : index
    %c0_22 = arith.constant 0 : index
    %48 = vector.load %arg5[%c1, %c0_21, %c0_22] : memref<2x2x32xf32, #tpu.memory_space<vmem>>, vector<1x2x32xf32>
    %49 = vector.shape_cast %48 : vector<1x2x32xf32> to vector<2x32xf32>
    %c0_23 = arith.constant 0 : index
    %c0_24 = arith.constant 0 : index
    %c0_25 = arith.constant 0 : index
    %50 = vector.load %arg6[%c0_23, %c0_24, %c0_25] : memref<2x2x32xf32, #tpu.memory_space<vmem>>, vector<1x2x32xf32>
    %51 = vector.shape_cast %50 : vector<1x2x32xf32> to vector<2x32xf32>
    %c1_26 = arith.constant 1 : index
    %c0_27 = arith.constant 0 : index
    %c0_28 = arith.constant 0 : index
    %52 = vector.load %arg6[%c1_26, %c0_27, %c0_28] : memref<2x2x32xf32, #tpu.memory_space<vmem>>, vector<1x2x32xf32>
    %53 = vector.shape_cast %52 : vector<1x2x32xf32> to vector<2x32xf32>
    %54 = vector.extract_strided_slice %45 {offsets = [0, 0], sizes = [1, 128], strides = [1, 1]} : vector<16x128xf32> to vector<1x128xf32>
    %55 = vector.extract_strided_slice %45 {offsets = [8, 0], sizes = [1, 128], strides = [1, 1]} : vector<16x128xf32> to vector<1x128xf32>
    %56 = tpu.concatenate %54, %55 in 0 : vector<1x128xf32>, vector<1x128xf32> -> vector<2x128xf32>
    %c0_29 = arith.constant 0 : index
    %c0_30 = arith.constant 0 : index
    %c0_31 = arith.constant 0 : index
    %57 = vector.load %arg8[%c0_29, %c0_30, %c0_31] : memref<2x32x128xf32, #tpu.memory_space<vmem>>, vector<1x32x128xf32>
    %58 = vector.shape_cast %57 : vector<1x32x128xf32> to vector<32x128xf32>
    %cst_32 = arith.constant dense<0.000000e+00> : vector<2x128xf32>
    %59 = tpu.matmul %47, %58, %cst_32 {dimension_numbers = #tpu.dot_dimension_numbers<[1], [0], [0], [1], [0, 0, 1, 1], [], []>} : vector<2x32xf32>, vector<32x128xf32>, vector<2x128xf32> -> vector<2x128xf32>
    %60 = arith.addf %56, %59 : vector<2x128xf32>
    %61 = arith.negf %60 : vector<2x128xf32>
    %62 = math.exp %61 : vector<2x128xf32>
    %cst_33 = arith.constant 1.000000e+00 : f32
    %63 = vector.broadcast %cst_33 : f32 to vector<2x128xf32>
    %64 = arith.addf %63, %62 : vector<2x128xf32>
    %65 = arith.divf %63, %64 : vector<2x128xf32>
    %66 = vector.extract_strided_slice %65 {offsets = [0, 0], sizes = [2, 32], strides = [1, 1]} : vector<2x128xf32> to vector<2x32xf32>
    %67 = vector.extract_strided_slice %65 {offsets = [0, 32], sizes = [2, 32], strides = [1, 1]} : vector<2x128xf32> to vector<2x32xf32>
    %68 = vector.extract_strided_slice %65 {offsets = [0, 96], sizes = [2, 32], strides = [1, 1]} : vector<2x128xf32> to vector<2x32xf32>
    %69 = vector.extract_strided_slice %60 {offsets = [0, 64], sizes = [2, 32], strides = [1, 1]} : vector<2x128xf32> to vector<2x32xf32>
    %70 = math.tanh %69 : vector<2x32xf32>
    %71 = arith.mulf %67, %51 : vector<2x32xf32>
    %72 = arith.mulf %66, %70 : vector<2x32xf32>
    %73 = arith.addf %71, %72 : vector<2x32xf32>
    %74 = math.tanh %73 : vector<2x32xf32>
    %75 = arith.mulf %68, %74 : vector<2x32xf32>
    %c1_34 = arith.constant 1 : index
    %c0_35 = arith.constant 0 : index
    %c0_36 = arith.constant 0 : index
    %76 = vector.load %arg7[%c1_34, %c0_35, %c0_36] : memref<2x32x128xf32, #tpu.memory_space<vmem>>, vector<1x32x128xf32>
    %77 = vector.shape_cast %76 : vector<1x32x128xf32> to vector<32x128xf32>
    %cst_37 = arith.constant dense<0.000000e+00> : vector<2x128xf32>
    %78 = tpu.matmul %75, %77, %cst_37 {dimension_numbers = #tpu.dot_dimension_numbers<[1], [0], [0], [1], [0, 0, 1, 1], [], []>} : vector<2x32xf32>, vector<32x128xf32>, vector<2x128xf32> -> vector<2x128xf32>
    %c1_38 = arith.constant 1 : index
    %c0_39 = arith.constant 0 : index
    %c0_40 = arith.constant 0 : index
    %79 = vector.load %arg9[%c1_38, %c0_39, %c0_40] : memref<2x1x128xf32, #tpu.memory_space<vmem>>, vector<1x1x128xf32>
    %80 = vector.shape_cast %79 : vector<1x1x128xf32> to vector<1x128xf32>
    %81 = vector.broadcast %80 : vector<1x128xf32> to vector<2x128xf32>
    %82 = arith.addf %78, %81 : vector<2x128xf32>
    %c1_41 = arith.constant 1 : index
    %c0_42 = arith.constant 0 : index
    %c0_43 = arith.constant 0 : index
    %83 = vector.load %arg8[%c1_41, %c0_42, %c0_43] : memref<2x32x128xf32, #tpu.memory_space<vmem>>, vector<1x32x128xf32>
    %84 = vector.shape_cast %83 : vector<1x32x128xf32> to vector<32x128xf32>
    %cst_44 = arith.constant dense<0.000000e+00> : vector<2x128xf32>
    %85 = tpu.matmul %49, %84, %cst_44 {dimension_numbers = #tpu.dot_dimension_numbers<[1], [0], [0], [1], [0, 0, 1, 1], [], []>} : vector<2x32xf32>, vector<32x128xf32>, vector<2x128xf32> -> vector<2x128xf32>
    %86 = arith.addf %82, %85 : vector<2x128xf32>
    %87 = arith.negf %86 : vector<2x128xf32>
    %88 = math.exp %87 : vector<2x128xf32>
    %cst_45 = arith.constant 1.000000e+00 : f32
    %89 = vector.broadcast %cst_45 : f32 to vector<2x128xf32>
    %90 = arith.addf %89, %88 : vector<2x128xf32>
    %91 = arith.divf %89, %90 : vector<2x128xf32>
    %92 = vector.extract_strided_slice %91 {offsets = [0, 0], sizes = [2, 32], strides = [1, 1]} : vector<2x128xf32> to vector<2x32xf32>
    %93 = vector.extract_strided_slice %91 {offsets = [0, 32], sizes = [2, 32], strides = [1, 1]} : vector<2x128xf32> to vector<2x32xf32>
    %94 = vector.extract_strided_slice %91 {offsets = [0, 96], sizes = [2, 32], strides = [1, 1]} : vector<2x128xf32> to vector<2x32xf32>
    %95 = vector.extract_strided_slice %86 {offsets = [0, 64], sizes = [2, 32], strides = [1, 1]} : vector<2x128xf32> to vector<2x32xf32>
    %96 = math.tanh %95 : vector<2x32xf32>
    %97 = arith.mulf %93, %53 : vector<2x32xf32>
    %98 = arith.mulf %92, %96 : vector<2x32xf32>
    %99 = arith.addf %97, %98 : vector<2x32xf32>
    %100 = math.tanh %99 : vector<2x32xf32>
    %101 = arith.mulf %94, %100 : vector<2x32xf32>
    %102 = vector.extract_strided_slice %45 {offsets = [1, 0], sizes = [1, 128], strides = [1, 1]} : vector<16x128xf32> to vector<1x128xf32>
    %103 = vector.extract_strided_slice %45 {offsets = [9, 0], sizes = [1, 128], strides = [1, 1]} : vector<16x128xf32> to vector<1x128xf32>
    %104 = tpu.concatenate %102, %103 in 0 : vector<1x128xf32>, vector<1x128xf32> -> vector<2x128xf32>
    %c0_46 = arith.constant 0 : index
    %c0_47 = arith.constant 0 : index
    %c0_48 = arith.constant 0 : index
    %105 = vector.load %arg8[%c0_46, %c0_47, %c0_48] : memref<2x32x128xf32, #tpu.memory_space<vmem>>, vector<1x32x128xf32>
    %106 = vector.shape_cast %105 : vector<1x32x128xf32> to vector<32x128xf32>
    %cst_49 = arith.constant dense<0.000000e+00> : vector<2x128xf32>
    %107 = tpu.matmul %75, %106, %cst_49 {dimension_numbers = #tpu.dot_dimension_numbers<[1], [0], [0], [1], [0, 0, 1, 1], [], []>} : vector<2x32xf32>, vector<32x128xf32>, vector<2x128xf32> -> vector<2x128xf32>
    %108 = arith.addf %104, %107 : vector<2x128xf32>
    %109 = arith.negf %108 : vector<2x128xf32>
    %110 = math.exp %109 : vector<2x128xf32>
    %cst_50 = arith.constant 1.000000e+00 : f32
    %111 = vector.broadcast %cst_50 : f32 to vector<2x128xf32>
    %112 = arith.addf %111, %110 : vector<2x128xf32>
    %113 = arith.divf %111, %112 : vector<2x128xf32>
    %114 = vector.extract_strided_slice %113 {offsets = [0, 0], sizes = [2, 32], strides = [1, 1]} : vector<2x128xf32> to vector<2x32xf32>
    %115 = vector.extract_strided_slice %113 {offsets = [0, 32], sizes = [2, 32], strides = [1, 1]} : vector<2x128xf32> to vector<2x32xf32>
    %116 = vector.extract_strided_slice %113 {offsets = [0, 96], sizes = [2, 32], strides = [1, 1]} : vector<2x128xf32> to vector<2x32xf32>
    %117 = vector.extract_strided_slice %108 {offsets = [0, 64], sizes = [2, 32], strides = [1, 1]} : vector<2x128xf32> to vector<2x32xf32>
    %118 = math.tanh %117 : vector<2x32xf32>
    %119 = arith.mulf %115, %73 : vector<2x32xf32>
    %120 = arith.mulf %114, %118 : vector<2x32xf32>
    %121 = arith.addf %119, %120 : vector<2x32xf32>
    %122 = math.tanh %121 : vector<2x32xf32>
    %123 = arith.mulf %116, %122 : vector<2x32xf32>
    %c1_51 = arith.constant 1 : index
    %c0_52 = arith.constant 0 : index
    %c0_53 = arith.constant 0 : index
    %124 = vector.load %arg7[%c1_51, %c0_52, %c0_53] : memref<2x32x128xf32, #tpu.memory_space<vmem>>, vector<1x32x128xf32>
    %125 = vector.shape_cast %124 : vector<1x32x128xf32> to vector<32x128xf32>
    %cst_54 = arith.constant dense<0.000000e+00> : vector<2x128xf32>
    %126 = tpu.matmul %123, %125, %cst_54 {dimension_numbers = #tpu.dot_dimension_numbers<[1], [0], [0], [1], [0, 0, 1, 1], [], []>} : vector<2x32xf32>, vector<32x128xf32>, vector<2x128xf32> -> vector<2x128xf32>
    %c1_55 = arith.constant 1 : index
    %c0_56 = arith.constant 0 : index
    %c0_57 = arith.constant 0 : index
    %127 = vector.load %arg9[%c1_55, %c0_56, %c0_57] : memref<2x1x128xf32, #tpu.memory_space<vmem>>, vector<1x1x128xf32>
    %128 = vector.shape_cast %127 : vector<1x1x128xf32> to vector<1x128xf32>
    %129 = vector.broadcast %128 : vector<1x128xf32> to vector<2x128xf32>
    %130 = arith.addf %126, %129 : vector<2x128xf32>
    %c1_58 = arith.constant 1 : index
    %c0_59 = arith.constant 0 : index
    %c0_60 = arith.constant 0 : index
    %131 = vector.load %arg8[%c1_58, %c0_59, %c0_60] : memref<2x32x128xf32, #tpu.memory_space<vmem>>, vector<1x32x128xf32>
    %132 = vector.shape_cast %131 : vector<1x32x128xf32> to vector<32x128xf32>
    %cst_61 = arith.constant dense<0.000000e+00> : vector<2x128xf32>
    %133 = tpu.matmul %101, %132, %cst_61 {dimension_numbers = #tpu.dot_dimension_numbers<[1], [0], [0], [1], [0, 0, 1, 1], [], []>} : vector<2x32xf32>, vector<32x128xf32>, vector<2x128xf32> -> vector<2x128xf32>
    %134 = arith.addf %130, %133 : vector<2x128xf32>
    %135 = arith.negf %134 : vector<2x128xf32>
    %136 = math.exp %135 : vector<2x128xf32>
    %cst_62 = arith.constant 1.000000e+00 : f32
    %137 = vector.broadcast %cst_62 : f32 to vector<2x128xf32>
    %138 = arith.addf %137, %136 : vector<2x128xf32>
    %139 = arith.divf %137, %138 : vector<2x128xf32>
    %140 = vector.extract_strided_slice %139 {offsets = [0, 0], sizes = [2, 32], strides = [1, 1]} : vector<2x128xf32> to vector<2x32xf32>
    %141 = vector.extract_strided_slice %139 {offsets = [0, 32], sizes = [2, 32], strides = [1, 1]} : vector<2x128xf32> to vector<2x32xf32>
    %142 = vector.extract_strided_slice %139 {offsets = [0, 96], sizes = [2, 32], strides = [1, 1]} : vector<2x128xf32> to vector<2x32xf32>
    %143 = vector.extract_strided_slice %134 {offsets = [0, 64], sizes = [2, 32], strides = [1, 1]} : vector<2x128xf32> to vector<2x32xf32>
    %144 = math.tanh %143 : vector<2x32xf32>
    %145 = arith.mulf %141, %99 : vector<2x32xf32>
    %146 = arith.mulf %140, %144 : vector<2x32xf32>
    %147 = arith.addf %145, %146 : vector<2x32xf32>
    %148 = math.tanh %147 : vector<2x32xf32>
    %149 = arith.mulf %142, %148 : vector<2x32xf32>
    %150 = vector.extract_strided_slice %45 {offsets = [2, 0], sizes = [1, 128], strides = [1, 1]} : vector<16x128xf32> to vector<1x128xf32>
    %151 = vector.extract_strided_slice %45 {offsets = [10, 0], sizes = [1, 128], strides = [1, 1]} : vector<16x128xf32> to vector<1x128xf32>
    %152 = tpu.concatenate %150, %151 in 0 : vector<1x128xf32>, vector<1x128xf32> -> vector<2x128xf32>
    %c0_63 = arith.constant 0 : index
    %c0_64 = arith.constant 0 : index
    %c0_65 = arith.constant 0 : index
    %153 = vector.load %arg8[%c0_63, %c0_64, %c0_65] : memref<2x32x128xf32, #tpu.memory_space<vmem>>, vector<1x32x128xf32>
    %154 = vector.shape_cast %153 : vector<1x32x128xf32> to vector<32x128xf32>
    %cst_66 = arith.constant dense<0.000000e+00> : vector<2x128xf32>
    %155 = tpu.matmul %123, %154, %cst_66 {dimension_numbers = #tpu.dot_dimension_numbers<[1], [0], [0], [1], [0, 0, 1, 1], [], []>} : vector<2x32xf32>, vector<32x128xf32>, vector<2x128xf32> -> vector<2x128xf32>
    %156 = arith.addf %152, %155 : vector<2x128xf32>
    %157 = arith.negf %156 : vector<2x128xf32>
    %158 = math.exp %157 : vector<2x128xf32>
    %cst_67 = arith.constant 1.000000e+00 : f32
    %159 = vector.broadcast %cst_67 : f32 to vector<2x128xf32>
    %160 = arith.addf %159, %158 : vector<2x128xf32>
    %161 = arith.divf %159, %160 : vector<2x128xf32>
    %162 = vector.extract_strided_slice %161 {offsets = [0, 0], sizes = [2, 32], strides = [1, 1]} : vector<2x128xf32> to vector<2x32xf32>
    %163 = vector.extract_strided_slice %161 {offsets = [0, 32], sizes = [2, 32], strides = [1, 1]} : vector<2x128xf32> to vector<2x32xf32>
    %164 = vector.extract_strided_slice %161 {offsets = [0, 96], sizes = [2, 32], strides = [1, 1]} : vector<2x128xf32> to vector<2x32xf32>
    %165 = vector.extract_strided_slice %156 {offsets = [0, 64], sizes = [2, 32], strides = [1, 1]} : vector<2x128xf32> to vector<2x32xf32>
    %166 = math.tanh %165 : vector<2x32xf32>
    %167 = arith.mulf %163, %121 : vector<2x32xf32>
    %168 = arith.mulf %162, %166 : vector<2x32xf32>
    %169 = arith.addf %167, %168 : vector<2x32xf32>
    %170 = math.tanh %169 : vector<2x32xf32>
    %171 = arith.mulf %164, %170 : vector<2x32xf32>
    %c1_68 = arith.constant 1 : index
    %c0_69 = arith.constant 0 : index
    %c0_70 = arith.constant 0 : index
    %172 = vector.load %arg7[%c1_68, %c0_69, %c0_70] : memref<2x32x128xf32, #tpu.memory_space<vmem>>, vector<1x32x128xf32>
    %173 = vector.shape_cast %172 : vector<1x32x128xf32> to vector<32x128xf32>
    %cst_71 = arith.constant dense<0.000000e+00> : vector<2x128xf32>
    %174 = tpu.matmul %171, %173, %cst_71 {dimension_numbers = #tpu.dot_dimension_numbers<[1], [0], [0], [1], [0, 0, 1, 1], [], []>} : vector<2x32xf32>, vector<32x128xf32>, vector<2x128xf32> -> vector<2x128xf32>
    %c1_72 = arith.constant 1 : index
    %c0_73 = arith.constant 0 : index
    %c0_74 = arith.constant 0 : index
    %175 = vector.load %arg9[%c1_72, %c0_73, %c0_74] : memref<2x1x128xf32, #tpu.memory_space<vmem>>, vector<1x1x128xf32>
    %176 = vector.shape_cast %175 : vector<1x1x128xf32> to vector<1x128xf32>
    %177 = vector.broadcast %176 : vector<1x128xf32> to vector<2x128xf32>
    %178 = arith.addf %174, %177 : vector<2x128xf32>
    %c1_75 = arith.constant 1 : index
    %c0_76 = arith.constant 0 : index
    %c0_77 = arith.constant 0 : index
    %179 = vector.load %arg8[%c1_75, %c0_76, %c0_77] : memref<2x32x128xf32, #tpu.memory_space<vmem>>, vector<1x32x128xf32>
    %180 = vector.shape_cast %179 : vector<1x32x128xf32> to vector<32x128xf32>
    %cst_78 = arith.constant dense<0.000000e+00> : vector<2x128xf32>
    %181 = tpu.matmul %149, %180, %cst_78 {dimension_numbers = #tpu.dot_dimension_numbers<[1], [0], [0], [1], [0, 0, 1, 1], [], []>} : vector<2x32xf32>, vector<32x128xf32>, vector<2x128xf32> -> vector<2x128xf32>
    %182 = arith.addf %178, %181 : vector<2x128xf32>
    %183 = arith.negf %182 : vector<2x128xf32>
    %184 = math.exp %183 : vector<2x128xf32>
    %cst_79 = arith.constant 1.000000e+00 : f32
    %185 = vector.broadcast %cst_79 : f32 to vector<2x128xf32>
    %186 = arith.addf %185, %184 : vector<2x128xf32>
    %187 = arith.divf %185, %186 : vector<2x128xf32>
    %188 = vector.extract_strided_slice %187 {offsets = [0, 0], sizes = [2, 32], strides = [1, 1]} : vector<2x128xf32> to vector<2x32xf32>
    %189 = vector.extract_strided_slice %187 {offsets = [0, 32], sizes = [2, 32], strides = [1, 1]} : vector<2x128xf32> to vector<2x32xf32>
    %190 = vector.extract_strided_slice %187 {offsets = [0, 96], sizes = [2, 32], strides = [1, 1]} : vector<2x128xf32> to vector<2x32xf32>
    %191 = vector.extract_strided_slice %182 {offsets = [0, 64], sizes = [2, 32], strides = [1, 1]} : vector<2x128xf32> to vector<2x32xf32>
    %192 = math.tanh %191 : vector<2x32xf32>
    %193 = arith.mulf %189, %147 : vector<2x32xf32>
    %194 = arith.mulf %188, %192 : vector<2x32xf32>
    %195 = arith.addf %193, %194 : vector<2x32xf32>
    %196 = math.tanh %195 : vector<2x32xf32>
    %197 = arith.mulf %190, %196 : vector<2x32xf32>
    %198 = vector.extract_strided_slice %45 {offsets = [3, 0], sizes = [1, 128], strides = [1, 1]} : vector<16x128xf32> to vector<1x128xf32>
    %199 = vector.extract_strided_slice %45 {offsets = [11, 0], sizes = [1, 128], strides = [1, 1]} : vector<16x128xf32> to vector<1x128xf32>
    %200 = tpu.concatenate %198, %199 in 0 : vector<1x128xf32>, vector<1x128xf32> -> vector<2x128xf32>
    %c0_80 = arith.constant 0 : index
    %c0_81 = arith.constant 0 : index
    %c0_82 = arith.constant 0 : index
    %201 = vector.load %arg8[%c0_80, %c0_81, %c0_82] : memref<2x32x128xf32, #tpu.memory_space<vmem>>, vector<1x32x128xf32>
    %202 = vector.shape_cast %201 : vector<1x32x128xf32> to vector<32x128xf32>
    %cst_83 = arith.constant dense<0.000000e+00> : vector<2x128xf32>
    %203 = tpu.matmul %171, %202, %cst_83 {dimension_numbers = #tpu.dot_dimension_numbers<[1], [0], [0], [1], [0, 0, 1, 1], [], []>} : vector<2x32xf32>, vector<32x128xf32>, vector<2x128xf32> -> vector<2x128xf32>
    %204 = arith.addf %200, %203 : vector<2x128xf32>
    %205 = arith.negf %204 : vector<2x128xf32>
    %206 = math.exp %205 : vector<2x128xf32>
    %cst_84 = arith.constant 1.000000e+00 : f32
    %207 = vector.broadcast %cst_84 : f32 to vector<2x128xf32>
    %208 = arith.addf %207, %206 : vector<2x128xf32>
    %209 = arith.divf %207, %208 : vector<2x128xf32>
    %210 = vector.extract_strided_slice %209 {offsets = [0, 0], sizes = [2, 32], strides = [1, 1]} : vector<2x128xf32> to vector<2x32xf32>
    %211 = vector.extract_strided_slice %209 {offsets = [0, 32], sizes = [2, 32], strides = [1, 1]} : vector<2x128xf32> to vector<2x32xf32>
    %212 = vector.extract_strided_slice %209 {offsets = [0, 96], sizes = [2, 32], strides = [1, 1]} : vector<2x128xf32> to vector<2x32xf32>
    %213 = vector.extract_strided_slice %204 {offsets = [0, 64], sizes = [2, 32], strides = [1, 1]} : vector<2x128xf32> to vector<2x32xf32>
    %214 = math.tanh %213 : vector<2x32xf32>
    %215 = arith.mulf %211, %169 : vector<2x32xf32>
    %216 = arith.mulf %210, %214 : vector<2x32xf32>
    %217 = arith.addf %215, %216 : vector<2x32xf32>
    %218 = math.tanh %217 : vector<2x32xf32>
    %219 = arith.mulf %212, %218 : vector<2x32xf32>
    %c1_85 = arith.constant 1 : index
    %c0_86 = arith.constant 0 : index
    %c0_87 = arith.constant 0 : index
    %220 = vector.load %arg7[%c1_85, %c0_86, %c0_87] : memref<2x32x128xf32, #tpu.memory_space<vmem>>, vector<1x32x128xf32>
    %221 = vector.shape_cast %220 : vector<1x32x128xf32> to vector<32x128xf32>
    %cst_88 = arith.constant dense<0.000000e+00> : vector<2x128xf32>
    %222 = tpu.matmul %219, %221, %cst_88 {dimension_numbers = #tpu.dot_dimension_numbers<[1], [0], [0], [1], [0, 0, 1, 1], [], []>} : vector<2x32xf32>, vector<32x128xf32>, vector<2x128xf32> -> vector<2x128xf32>
    %c1_89 = arith.constant 1 : index
    %c0_90 = arith.constant 0 : index
    %c0_91 = arith.constant 0 : index
    %223 = vector.load %arg9[%c1_89, %c0_90, %c0_91] : memref<2x1x128xf32, #tpu.memory_space<vmem>>, vector<1x1x128xf32>
    %224 = vector.shape_cast %223 : vector<1x1x128xf32> to vector<1x128xf32>
    %225 = vector.broadcast %224 : vector<1x128xf32> to vector<2x128xf32>
    %226 = arith.addf %222, %225 : vector<2x128xf32>
    %c1_92 = arith.constant 1 : index
    %c0_93 = arith.constant 0 : index
    %c0_94 = arith.constant 0 : index
    %227 = vector.load %arg8[%c1_92, %c0_93, %c0_94] : memref<2x32x128xf32, #tpu.memory_space<vmem>>, vector<1x32x128xf32>
    %228 = vector.shape_cast %227 : vector<1x32x128xf32> to vector<32x128xf32>
    %cst_95 = arith.constant dense<0.000000e+00> : vector<2x128xf32>
    %229 = tpu.matmul %197, %228, %cst_95 {dimension_numbers = #tpu.dot_dimension_numbers<[1], [0], [0], [1], [0, 0, 1, 1], [], []>} : vector<2x32xf32>, vector<32x128xf32>, vector<2x128xf32> -> vector<2x128xf32>
    %230 = arith.addf %226, %229 : vector<2x128xf32>
    %231 = arith.negf %230 : vector<2x128xf32>
    %232 = math.exp %231 : vector<2x128xf32>
    %cst_96 = arith.constant 1.000000e+00 : f32
    %233 = vector.broadcast %cst_96 : f32 to vector<2x128xf32>
    %234 = arith.addf %233, %232 : vector<2x128xf32>
    %235 = arith.divf %233, %234 : vector<2x128xf32>
    %236 = vector.extract_strided_slice %235 {offsets = [0, 0], sizes = [2, 32], strides = [1, 1]} : vector<2x128xf32> to vector<2x32xf32>
    %237 = vector.extract_strided_slice %235 {offsets = [0, 32], sizes = [2, 32], strides = [1, 1]} : vector<2x128xf32> to vector<2x32xf32>
    %238 = vector.extract_strided_slice %235 {offsets = [0, 96], sizes = [2, 32], strides = [1, 1]} : vector<2x128xf32> to vector<2x32xf32>
    %239 = vector.extract_strided_slice %230 {offsets = [0, 64], sizes = [2, 32], strides = [1, 1]} : vector<2x128xf32> to vector<2x32xf32>
    %240 = math.tanh %239 : vector<2x32xf32>
    %241 = arith.mulf %237, %195 : vector<2x32xf32>
    %242 = arith.mulf %236, %240 : vector<2x32xf32>
    %243 = arith.addf %241, %242 : vector<2x32xf32>
    %244 = math.tanh %243 : vector<2x32xf32>
    %245 = arith.mulf %238, %244 : vector<2x32xf32>
    %246 = vector.extract_strided_slice %45 {offsets = [4, 0], sizes = [1, 128], strides = [1, 1]} : vector<16x128xf32> to vector<1x128xf32>
    %247 = vector.extract_strided_slice %45 {offsets = [12, 0], sizes = [1, 128], strides = [1, 1]} : vector<16x128xf32> to vector<1x128xf32>
    %248 = tpu.concatenate %246, %247 in 0 : vector<1x128xf32>, vector<1x128xf32> -> vector<2x128xf32>
    %c0_97 = arith.constant 0 : index
    %c0_98 = arith.constant 0 : index
    %c0_99 = arith.constant 0 : index
    %249 = vector.load %arg8[%c0_97, %c0_98, %c0_99] : memref<2x32x128xf32, #tpu.memory_space<vmem>>, vector<1x32x128xf32>
    %250 = vector.shape_cast %249 : vector<1x32x128xf32> to vector<32x128xf32>
    %cst_100 = arith.constant dense<0.000000e+00> : vector<2x128xf32>
    %251 = tpu.matmul %219, %250, %cst_100 {dimension_numbers = #tpu.dot_dimension_numbers<[1], [0], [0], [1], [0, 0, 1, 1], [], []>} : vector<2x32xf32>, vector<32x128xf32>, vector<2x128xf32> -> vector<2x128xf32>
    %252 = arith.addf %248, %251 : vector<2x128xf32>
    %253 = arith.negf %252 : vector<2x128xf32>
    %254 = math.exp %253 : vector<2x128xf32>
    %cst_101 = arith.constant 1.000000e+00 : f32
    %255 = vector.broadcast %cst_101 : f32 to vector<2x128xf32>
    %256 = arith.addf %255, %254 : vector<2x128xf32>
    %257 = arith.divf %255, %256 : vector<2x128xf32>
    %258 = vector.extract_strided_slice %257 {offsets = [0, 0], sizes = [2, 32], strides = [1, 1]} : vector<2x128xf32> to vector<2x32xf32>
    %259 = vector.extract_strided_slice %257 {offsets = [0, 32], sizes = [2, 32], strides = [1, 1]} : vector<2x128xf32> to vector<2x32xf32>
    %260 = vector.extract_strided_slice %257 {offsets = [0, 96], sizes = [2, 32], strides = [1, 1]} : vector<2x128xf32> to vector<2x32xf32>
    %261 = vector.extract_strided_slice %252 {offsets = [0, 64], sizes = [2, 32], strides = [1, 1]} : vector<2x128xf32> to vector<2x32xf32>
    %262 = math.tanh %261 : vector<2x32xf32>
    %263 = arith.mulf %259, %217 : vector<2x32xf32>
    %264 = arith.mulf %258, %262 : vector<2x32xf32>
    %265 = arith.addf %263, %264 : vector<2x32xf32>
    %266 = math.tanh %265 : vector<2x32xf32>
    %267 = arith.mulf %260, %266 : vector<2x32xf32>
    %c1_102 = arith.constant 1 : index
    %c0_103 = arith.constant 0 : index
    %c0_104 = arith.constant 0 : index
    %268 = vector.load %arg7[%c1_102, %c0_103, %c0_104] : memref<2x32x128xf32, #tpu.memory_space<vmem>>, vector<1x32x128xf32>
    %269 = vector.shape_cast %268 : vector<1x32x128xf32> to vector<32x128xf32>
    %cst_105 = arith.constant dense<0.000000e+00> : vector<2x128xf32>
    %270 = tpu.matmul %267, %269, %cst_105 {dimension_numbers = #tpu.dot_dimension_numbers<[1], [0], [0], [1], [0, 0, 1, 1], [], []>} : vector<2x32xf32>, vector<32x128xf32>, vector<2x128xf32> -> vector<2x128xf32>
    %c1_106 = arith.constant 1 : index
    %c0_107 = arith.constant 0 : index
    %c0_108 = arith.constant 0 : index
    %271 = vector.load %arg9[%c1_106, %c0_107, %c0_108] : memref<2x1x128xf32, #tpu.memory_space<vmem>>, vector<1x1x128xf32>
    %272 = vector.shape_cast %271 : vector<1x1x128xf32> to vector<1x128xf32>
    %273 = vector.broadcast %272 : vector<1x128xf32> to vector<2x128xf32>
    %274 = arith.addf %270, %273 : vector<2x128xf32>
    %c1_109 = arith.constant 1 : index
    %c0_110 = arith.constant 0 : index
    %c0_111 = arith.constant 0 : index
    %275 = vector.load %arg8[%c1_109, %c0_110, %c0_111] : memref<2x32x128xf32, #tpu.memory_space<vmem>>, vector<1x32x128xf32>
    %276 = vector.shape_cast %275 : vector<1x32x128xf32> to vector<32x128xf32>
    %cst_112 = arith.constant dense<0.000000e+00> : vector<2x128xf32>
    %277 = tpu.matmul %245, %276, %cst_112 {dimension_numbers = #tpu.dot_dimension_numbers<[1], [0], [0], [1], [0, 0, 1, 1], [], []>} : vector<2x32xf32>, vector<32x128xf32>, vector<2x128xf32> -> vector<2x128xf32>
    %278 = arith.addf %274, %277 : vector<2x128xf32>
    %279 = arith.negf %278 : vector<2x128xf32>
    %280 = math.exp %279 : vector<2x128xf32>
    %cst_113 = arith.constant 1.000000e+00 : f32
    %281 = vector.broadcast %cst_113 : f32 to vector<2x128xf32>
    %282 = arith.addf %281, %280 : vector<2x128xf32>
    %283 = arith.divf %281, %282 : vector<2x128xf32>
    %284 = vector.extract_strided_slice %283 {offsets = [0, 0], sizes = [2, 32], strides = [1, 1]} : vector<2x128xf32> to vector<2x32xf32>
    %285 = vector.extract_strided_slice %283 {offsets = [0, 32], sizes = [2, 32], strides = [1, 1]} : vector<2x128xf32> to vector<2x32xf32>
    %286 = vector.extract_strided_slice %283 {offsets = [0, 96], sizes = [2, 32], strides = [1, 1]} : vector<2x128xf32> to vector<2x32xf32>
    %287 = vector.extract_strided_slice %278 {offsets = [0, 64], sizes = [2, 32], strides = [1, 1]} : vector<2x128xf32> to vector<2x32xf32>
    %288 = math.tanh %287 : vector<2x32xf32>
    %289 = arith.mulf %285, %243 : vector<2x32xf32>
    %290 = arith.mulf %284, %288 : vector<2x32xf32>
    %291 = arith.addf %289, %290 : vector<2x32xf32>
    %292 = math.tanh %291 : vector<2x32xf32>
    %293 = arith.mulf %286, %292 : vector<2x32xf32>
    %294 = vector.extract_strided_slice %45 {offsets = [5, 0], sizes = [1, 128], strides = [1, 1]} : vector<16x128xf32> to vector<1x128xf32>
    %295 = vector.extract_strided_slice %45 {offsets = [13, 0], sizes = [1, 128], strides = [1, 1]} : vector<16x128xf32> to vector<1x128xf32>
    %296 = tpu.concatenate %294, %295 in 0 : vector<1x128xf32>, vector<1x128xf32> -> vector<2x128xf32>
    %c0_114 = arith.constant 0 : index
    %c0_115 = arith.constant 0 : index
    %c0_116 = arith.constant 0 : index
    %297 = vector.load %arg8[%c0_114, %c0_115, %c0_116] : memref<2x32x128xf32, #tpu.memory_space<vmem>>, vector<1x32x128xf32>
    %298 = vector.shape_cast %297 : vector<1x32x128xf32> to vector<32x128xf32>
    %cst_117 = arith.constant dense<0.000000e+00> : vector<2x128xf32>
    %299 = tpu.matmul %267, %298, %cst_117 {dimension_numbers = #tpu.dot_dimension_numbers<[1], [0], [0], [1], [0, 0, 1, 1], [], []>} : vector<2x32xf32>, vector<32x128xf32>, vector<2x128xf32> -> vector<2x128xf32>
    %300 = arith.addf %296, %299 : vector<2x128xf32>
    %301 = arith.negf %300 : vector<2x128xf32>
    %302 = math.exp %301 : vector<2x128xf32>
    %cst_118 = arith.constant 1.000000e+00 : f32
    %303 = vector.broadcast %cst_118 : f32 to vector<2x128xf32>
    %304 = arith.addf %303, %302 : vector<2x128xf32>
    %305 = arith.divf %303, %304 : vector<2x128xf32>
    %306 = vector.extract_strided_slice %305 {offsets = [0, 0], sizes = [2, 32], strides = [1, 1]} : vector<2x128xf32> to vector<2x32xf32>
    %307 = vector.extract_strided_slice %305 {offsets = [0, 32], sizes = [2, 32], strides = [1, 1]} : vector<2x128xf32> to vector<2x32xf32>
    %308 = vector.extract_strided_slice %305 {offsets = [0, 96], sizes = [2, 32], strides = [1, 1]} : vector<2x128xf32> to vector<2x32xf32>
    %309 = vector.extract_strided_slice %300 {offsets = [0, 64], sizes = [2, 32], strides = [1, 1]} : vector<2x128xf32> to vector<2x32xf32>
    %310 = math.tanh %309 : vector<2x32xf32>
    %311 = arith.mulf %307, %265 : vector<2x32xf32>
    %312 = arith.mulf %306, %310 : vector<2x32xf32>
    %313 = arith.addf %311, %312 : vector<2x32xf32>
    %314 = math.tanh %313 : vector<2x32xf32>
    %315 = arith.mulf %308, %314 : vector<2x32xf32>
    %c1_119 = arith.constant 1 : index
    %c0_120 = arith.constant 0 : index
    %c0_121 = arith.constant 0 : index
    %316 = vector.load %arg7[%c1_119, %c0_120, %c0_121] : memref<2x32x128xf32, #tpu.memory_space<vmem>>, vector<1x32x128xf32>
    %317 = vector.shape_cast %316 : vector<1x32x128xf32> to vector<32x128xf32>
    %cst_122 = arith.constant dense<0.000000e+00> : vector<2x128xf32>
    %318 = tpu.matmul %315, %317, %cst_122 {dimension_numbers = #tpu.dot_dimension_numbers<[1], [0], [0], [1], [0, 0, 1, 1], [], []>} : vector<2x32xf32>, vector<32x128xf32>, vector<2x128xf32> -> vector<2x128xf32>
    %c1_123 = arith.constant 1 : index
    %c0_124 = arith.constant 0 : index
    %c0_125 = arith.constant 0 : index
    %319 = vector.load %arg9[%c1_123, %c0_124, %c0_125] : memref<2x1x128xf32, #tpu.memory_space<vmem>>, vector<1x1x128xf32>
    %320 = vector.shape_cast %319 : vector<1x1x128xf32> to vector<1x128xf32>
    %321 = vector.broadcast %320 : vector<1x128xf32> to vector<2x128xf32>
    %322 = arith.addf %318, %321 : vector<2x128xf32>
    %c1_126 = arith.constant 1 : index
    %c0_127 = arith.constant 0 : index
    %c0_128 = arith.constant 0 : index
    %323 = vector.load %arg8[%c1_126, %c0_127, %c0_128] : memref<2x32x128xf32, #tpu.memory_space<vmem>>, vector<1x32x128xf32>
    %324 = vector.shape_cast %323 : vector<1x32x128xf32> to vector<32x128xf32>
    %cst_129 = arith.constant dense<0.000000e+00> : vector<2x128xf32>
    %325 = tpu.matmul %293, %324, %cst_129 {dimension_numbers = #tpu.dot_dimension_numbers<[1], [0], [0], [1], [0, 0, 1, 1], [], []>} : vector<2x32xf32>, vector<32x128xf32>, vector<2x128xf32> -> vector<2x128xf32>
    %326 = arith.addf %322, %325 : vector<2x128xf32>
    %327 = arith.negf %326 : vector<2x128xf32>
    %328 = math.exp %327 : vector<2x128xf32>
    %cst_130 = arith.constant 1.000000e+00 : f32
    %329 = vector.broadcast %cst_130 : f32 to vector<2x128xf32>
    %330 = arith.addf %329, %328 : vector<2x128xf32>
    %331 = arith.divf %329, %330 : vector<2x128xf32>
    %332 = vector.extract_strided_slice %331 {offsets = [0, 0], sizes = [2, 32], strides = [1, 1]} : vector<2x128xf32> to vector<2x32xf32>
    %333 = vector.extract_strided_slice %331 {offsets = [0, 32], sizes = [2, 32], strides = [1, 1]} : vector<2x128xf32> to vector<2x32xf32>
    %334 = vector.extract_strided_slice %331 {offsets = [0, 96], sizes = [2, 32], strides = [1, 1]} : vector<2x128xf32> to vector<2x32xf32>
    %335 = vector.extract_strided_slice %326 {offsets = [0, 64], sizes = [2, 32], strides = [1, 1]} : vector<2x128xf32> to vector<2x32xf32>
    %336 = math.tanh %335 : vector<2x32xf32>
    %337 = arith.mulf %333, %291 : vector<2x32xf32>
    %338 = arith.mulf %332, %336 : vector<2x32xf32>
    %339 = arith.addf %337, %338 : vector<2x32xf32>
    %340 = math.tanh %339 : vector<2x32xf32>
    %341 = arith.mulf %334, %340 : vector<2x32xf32>
    %342 = vector.extract_strided_slice %45 {offsets = [6, 0], sizes = [1, 128], strides = [1, 1]} : vector<16x128xf32> to vector<1x128xf32>
    %343 = vector.extract_strided_slice %45 {offsets = [14, 0], sizes = [1, 128], strides = [1, 1]} : vector<16x128xf32> to vector<1x128xf32>
    %344 = tpu.concatenate %342, %343 in 0 : vector<1x128xf32>, vector<1x128xf32> -> vector<2x128xf32>
    %c0_131 = arith.constant 0 : index
    %c0_132 = arith.constant 0 : index
    %c0_133 = arith.constant 0 : index
    %345 = vector.load %arg8[%c0_131, %c0_132, %c0_133] : memref<2x32x128xf32, #tpu.memory_space<vmem>>, vector<1x32x128xf32>
    %346 = vector.shape_cast %345 : vector<1x32x128xf32> to vector<32x128xf32>
    %cst_134 = arith.constant dense<0.000000e+00> : vector<2x128xf32>
    %347 = tpu.matmul %315, %346, %cst_134 {dimension_numbers = #tpu.dot_dimension_numbers<[1], [0], [0], [1], [0, 0, 1, 1], [], []>} : vector<2x32xf32>, vector<32x128xf32>, vector<2x128xf32> -> vector<2x128xf32>
    %348 = arith.addf %344, %347 : vector<2x128xf32>
    %349 = arith.negf %348 : vector<2x128xf32>
    %350 = math.exp %349 : vector<2x128xf32>
    %cst_135 = arith.constant 1.000000e+00 : f32
    %351 = vector.broadcast %cst_135 : f32 to vector<2x128xf32>
    %352 = arith.addf %351, %350 : vector<2x128xf32>
    %353 = arith.divf %351, %352 : vector<2x128xf32>
    %354 = vector.extract_strided_slice %353 {offsets = [0, 0], sizes = [2, 32], strides = [1, 1]} : vector<2x128xf32> to vector<2x32xf32>
    %355 = vector.extract_strided_slice %353 {offsets = [0, 32], sizes = [2, 32], strides = [1, 1]} : vector<2x128xf32> to vector<2x32xf32>
    %356 = vector.extract_strided_slice %353 {offsets = [0, 96], sizes = [2, 32], strides = [1, 1]} : vector<2x128xf32> to vector<2x32xf32>
    %357 = vector.extract_strided_slice %348 {offsets = [0, 64], sizes = [2, 32], strides = [1, 1]} : vector<2x128xf32> to vector<2x32xf32>
    %358 = math.tanh %357 : vector<2x32xf32>
    %359 = arith.mulf %355, %313 : vector<2x32xf32>
    %360 = arith.mulf %354, %358 : vector<2x32xf32>
    %361 = arith.addf %359, %360 : vector<2x32xf32>
    %362 = math.tanh %361 : vector<2x32xf32>
    %363 = arith.mulf %356, %362 : vector<2x32xf32>
    %c1_136 = arith.constant 1 : index
    %c0_137 = arith.constant 0 : index
    %c0_138 = arith.constant 0 : index
    %364 = vector.load %arg7[%c1_136, %c0_137, %c0_138] : memref<2x32x128xf32, #tpu.memory_space<vmem>>, vector<1x32x128xf32>
    %365 = vector.shape_cast %364 : vector<1x32x128xf32> to vector<32x128xf32>
    %cst_139 = arith.constant dense<0.000000e+00> : vector<2x128xf32>
    %366 = tpu.matmul %363, %365, %cst_139 {dimension_numbers = #tpu.dot_dimension_numbers<[1], [0], [0], [1], [0, 0, 1, 1], [], []>} : vector<2x32xf32>, vector<32x128xf32>, vector<2x128xf32> -> vector<2x128xf32>
    %c1_140 = arith.constant 1 : index
    %c0_141 = arith.constant 0 : index
    %c0_142 = arith.constant 0 : index
    %367 = vector.load %arg9[%c1_140, %c0_141, %c0_142] : memref<2x1x128xf32, #tpu.memory_space<vmem>>, vector<1x1x128xf32>
    %368 = vector.shape_cast %367 : vector<1x1x128xf32> to vector<1x128xf32>
    %369 = vector.broadcast %368 : vector<1x128xf32> to vector<2x128xf32>
    %370 = arith.addf %366, %369 : vector<2x128xf32>
    %c1_143 = arith.constant 1 : index
    %c0_144 = arith.constant 0 : index
    %c0_145 = arith.constant 0 : index
    %371 = vector.load %arg8[%c1_143, %c0_144, %c0_145] : memref<2x32x128xf32, #tpu.memory_space<vmem>>, vector<1x32x128xf32>
    %372 = vector.shape_cast %371 : vector<1x32x128xf32> to vector<32x128xf32>
    %cst_146 = arith.constant dense<0.000000e+00> : vector<2x128xf32>
    %373 = tpu.matmul %341, %372, %cst_146 {dimension_numbers = #tpu.dot_dimension_numbers<[1], [0], [0], [1], [0, 0, 1, 1], [], []>} : vector<2x32xf32>, vector<32x128xf32>, vector<2x128xf32> -> vector<2x128xf32>
    %374 = arith.addf %370, %373 : vector<2x128xf32>
    %375 = arith.negf %374 : vector<2x128xf32>
    %376 = math.exp %375 : vector<2x128xf32>
    %cst_147 = arith.constant 1.000000e+00 : f32
    %377 = vector.broadcast %cst_147 : f32 to vector<2x128xf32>
    %378 = arith.addf %377, %376 : vector<2x128xf32>
    %379 = arith.divf %377, %378 : vector<2x128xf32>
    %380 = vector.extract_strided_slice %379 {offsets = [0, 0], sizes = [2, 32], strides = [1, 1]} : vector<2x128xf32> to vector<2x32xf32>
    %381 = vector.extract_strided_slice %379 {offsets = [0, 32], sizes = [2, 32], strides = [1, 1]} : vector<2x128xf32> to vector<2x32xf32>
    %382 = vector.extract_strided_slice %379 {offsets = [0, 96], sizes = [2, 32], strides = [1, 1]} : vector<2x128xf32> to vector<2x32xf32>
    %383 = vector.extract_strided_slice %374 {offsets = [0, 64], sizes = [2, 32], strides = [1, 1]} : vector<2x128xf32> to vector<2x32xf32>
    %384 = math.tanh %383 : vector<2x32xf32>
    %385 = arith.mulf %381, %339 : vector<2x32xf32>
    %386 = arith.mulf %380, %384 : vector<2x32xf32>
    %387 = arith.addf %385, %386 : vector<2x32xf32>
    %388 = math.tanh %387 : vector<2x32xf32>
    %389 = arith.mulf %382, %388 : vector<2x32xf32>
    %390 = vector.extract_strided_slice %45 {offsets = [7, 0], sizes = [1, 128], strides = [1, 1]} : vector<16x128xf32> to vector<1x128xf32>
    %391 = vector.extract_strided_slice %45 {offsets = [15, 0], sizes = [1, 128], strides = [1, 1]} : vector<16x128xf32> to vector<1x128xf32>
    %392 = tpu.concatenate %390, %391 in 0 : vector<1x128xf32>, vector<1x128xf32> -> vector<2x128xf32>
    %c0_148 = arith.constant 0 : index
    %c0_149 = arith.constant 0 : index
    %c0_150 = arith.constant 0 : index
    %393 = vector.load %arg8[%c0_148, %c0_149, %c0_150] : memref<2x32x128xf32, #tpu.memory_space<vmem>>, vector<1x32x128xf32>
    %394 = vector.shape_cast %393 : vector<1x32x128xf32> to vector<32x128xf32>
    %cst_151 = arith.constant dense<0.000000e+00> : vector<2x128xf32>
    %395 = tpu.matmul %363, %394, %cst_151 {dimension_numbers = #tpu.dot_dimension_numbers<[1], [0], [0], [1], [0, 0, 1, 1], [], []>} : vector<2x32xf32>, vector<32x128xf32>, vector<2x128xf32> -> vector<2x128xf32>
    %396 = arith.addf %392, %395 : vector<2x128xf32>
    %397 = arith.negf %396 : vector<2x128xf32>
    %398 = math.exp %397 : vector<2x128xf32>
    %cst_152 = arith.constant 1.000000e+00 : f32
    %399 = vector.broadcast %cst_152 : f32 to vector<2x128xf32>
    %400 = arith.addf %399, %398 : vector<2x128xf32>
    %401 = arith.divf %399, %400 : vector<2x128xf32>
    %402 = vector.extract_strided_slice %401 {offsets = [0, 0], sizes = [2, 32], strides = [1, 1]} : vector<2x128xf32> to vector<2x32xf32>
    %403 = vector.extract_strided_slice %401 {offsets = [0, 32], sizes = [2, 32], strides = [1, 1]} : vector<2x128xf32> to vector<2x32xf32>
    %404 = vector.extract_strided_slice %401 {offsets = [0, 96], sizes = [2, 32], strides = [1, 1]} : vector<2x128xf32> to vector<2x32xf32>
    %405 = vector.extract_strided_slice %396 {offsets = [0, 64], sizes = [2, 32], strides = [1, 1]} : vector<2x128xf32> to vector<2x32xf32>
    %406 = math.tanh %405 : vector<2x32xf32>
    %407 = arith.mulf %403, %361 : vector<2x32xf32>
    %408 = arith.mulf %402, %406 : vector<2x32xf32>
    %409 = arith.addf %407, %408 : vector<2x32xf32>
    %410 = math.tanh %409 : vector<2x32xf32>
    %411 = arith.mulf %404, %410 : vector<2x32xf32>
    %c1_153 = arith.constant 1 : index
    %c0_154 = arith.constant 0 : index
    %c0_155 = arith.constant 0 : index
    %412 = vector.load %arg7[%c1_153, %c0_154, %c0_155] : memref<2x32x128xf32, #tpu.memory_space<vmem>>, vector<1x32x128xf32>
    %413 = vector.shape_cast %412 : vector<1x32x128xf32> to vector<32x128xf32>
    %cst_156 = arith.constant dense<0.000000e+00> : vector<2x128xf32>
    %414 = tpu.matmul %411, %413, %cst_156 {dimension_numbers = #tpu.dot_dimension_numbers<[1], [0], [0], [1], [0, 0, 1, 1], [], []>} : vector<2x32xf32>, vector<32x128xf32>, vector<2x128xf32> -> vector<2x128xf32>
    %c1_157 = arith.constant 1 : index
    %c0_158 = arith.constant 0 : index
    %c0_159 = arith.constant 0 : index
    %415 = vector.load %arg9[%c1_157, %c0_158, %c0_159] : memref<2x1x128xf32, #tpu.memory_space<vmem>>, vector<1x1x128xf32>
    %416 = vector.shape_cast %415 : vector<1x1x128xf32> to vector<1x128xf32>
    %417 = vector.broadcast %416 : vector<1x128xf32> to vector<2x128xf32>
    %418 = arith.addf %414, %417 : vector<2x128xf32>
    %c1_160 = arith.constant 1 : index
    %c0_161 = arith.constant 0 : index
    %c0_162 = arith.constant 0 : index
    %419 = vector.load %arg8[%c1_160, %c0_161, %c0_162] : memref<2x32x128xf32, #tpu.memory_space<vmem>>, vector<1x32x128xf32>
    %420 = vector.shape_cast %419 : vector<1x32x128xf32> to vector<32x128xf32>
    %cst_163 = arith.constant dense<0.000000e+00> : vector<2x128xf32>
    %421 = tpu.matmul %389, %420, %cst_163 {dimension_numbers = #tpu.dot_dimension_numbers<[1], [0], [0], [1], [0, 0, 1, 1], [], []>} : vector<2x32xf32>, vector<32x128xf32>, vector<2x128xf32> -> vector<2x128xf32>
    %422 = arith.addf %418, %421 : vector<2x128xf32>
    %423 = arith.negf %422 : vector<2x128xf32>
    %424 = math.exp %423 : vector<2x128xf32>
    %cst_164 = arith.constant 1.000000e+00 : f32
    %425 = vector.broadcast %cst_164 : f32 to vector<2x128xf32>
    %426 = arith.addf %425, %424 : vector<2x128xf32>
    %427 = arith.divf %425, %426 : vector<2x128xf32>
    %428 = vector.extract_strided_slice %427 {offsets = [0, 0], sizes = [2, 32], strides = [1, 1]} : vector<2x128xf32> to vector<2x32xf32>
    %429 = vector.extract_strided_slice %427 {offsets = [0, 32], sizes = [2, 32], strides = [1, 1]} : vector<2x128xf32> to vector<2x32xf32>
    %430 = vector.extract_strided_slice %427 {offsets = [0, 96], sizes = [2, 32], strides = [1, 1]} : vector<2x128xf32> to vector<2x32xf32>
    %431 = vector.extract_strided_slice %422 {offsets = [0, 64], sizes = [2, 32], strides = [1, 1]} : vector<2x128xf32> to vector<2x32xf32>
    %432 = math.tanh %431 : vector<2x32xf32>
    %433 = arith.mulf %429, %387 : vector<2x32xf32>
    %434 = arith.mulf %428, %432 : vector<2x32xf32>
    %435 = arith.addf %433, %434 : vector<2x32xf32>
    %436 = math.tanh %435 : vector<2x32xf32>
    %437 = arith.mulf %430, %436 : vector<2x32xf32>
    %c0_165 = arith.constant 0 : index
    %c0_166 = arith.constant 0 : index
    %438 = vector.load %arg10[%c0_165, %c0_166] : memref<32x4xf32, #tpu.memory_space<vmem>>, vector<32x4xf32>
    %cst_167 = arith.constant dense<0.000000e+00> : vector<2x4xf32>
    %439 = tpu.matmul %437, %438, %cst_167 {dimension_numbers = #tpu.dot_dimension_numbers<[1], [0], [0], [1], [0, 0, 1, 1], [], []>} : vector<2x32xf32>, vector<32x4xf32>, vector<2x4xf32> -> vector<2x4xf32>
    %c0_168 = arith.constant 0 : index
    %c0_169 = arith.constant 0 : index
    %440 = vector.load %arg11[%c0_168, %c0_169] : memref<1x4xf32, #tpu.memory_space<vmem>>, vector<1x4xf32>
    %441 = vector.broadcast %440 : vector<1x4xf32> to vector<2x4xf32>
    %442 = arith.addf %439, %441 : vector<2x4xf32>
    %c0_170 = arith.constant 0 : index
    %c0_171 = arith.constant 0 : index
    %443 = vector.load %arg12[%c0_170, %c0_171] : memref<2x4xf32, #tpu.memory_space<vmem>>, vector<2x4xf32>
    tpu.vector_store %arg12[%c0_170, %c0_171], %442 {strides = array<i32>} : memref<2x4xf32, #tpu.memory_space<vmem>>, vector<2x4xf32>,
    %c0_172 = arith.constant 0 : index
    %c0_173 = arith.constant 0 : index
    %c0_174 = arith.constant 0 : index
    %444 = vector.load %arg13[%c0_172, %c0_173, %c0_174] : memref<2x2x32xf32, #tpu.memory_space<vmem>>, vector<1x2x32xf32>
    %445 = vector.shape_cast %444 : vector<1x2x32xf32> to vector<2x32xf32>
    %446 = vector.shape_cast %411 : vector<2x32xf32> to vector<1x2x32xf32>
    tpu.vector_store %arg13[%c0_172, %c0_173, %c0_174], %446 {strides = array<i32>} : memref<2x2x32xf32, #tpu.memory_space<vmem>>, vector<1x2x32xf32>,
    %c0_175 = arith.constant 0 : index
    %c0_176 = arith.constant 0 : index
    %c0_177 = arith.constant 0 : index
    %447 = vector.load %arg14[%c0_175, %c0_176, %c0_177] : memref<2x2x32xf32, #tpu.memory_space<vmem>>, vector<1x2x32xf32>
    %448 = vector.shape_cast %447 : vector<1x2x32xf32> to vector<2x32xf32>
    %449 = vector.shape_cast %409 : vector<2x32xf32> to vector<1x2x32xf32>
    tpu.vector_store %arg14[%c0_175, %c0_176, %c0_177], %449 {strides = array<i32>} : memref<2x2x32xf32, #tpu.memory_space<vmem>>, vector<1x2x32xf32>,
    %c1_178 = arith.constant 1 : index
    %c0_179 = arith.constant 0 : index
    %c0_180 = arith.constant 0 : index
    %450 = vector.load %arg13[%c1_178, %c0_179, %c0_180] : memref<2x2x32xf32, #tpu.memory_space<vmem>>, vector<1x2x32xf32>
    %451 = vector.shape_cast %450 : vector<1x2x32xf32> to vector<2x32xf32>
    %452 = vector.shape_cast %437 : vector<2x32xf32> to vector<1x2x32xf32>
    tpu.vector_store %arg13[%c1_178, %c0_179, %c0_180], %452 {strides = array<i32>} : memref<2x2x32xf32, #tpu.memory_space<vmem>>, vector<1x2x32xf32>,
    %c1_181 = arith.constant 1 : index
    %c0_182 = arith.constant 0 : index
    %c0_183 = arith.constant 0 : index
    %453 = vector.load %arg14[%c1_181, %c0_182, %c0_183] : memref<2x2x32xf32, #tpu.memory_space<vmem>>, vector<1x2x32xf32>
    %454 = vector.shape_cast %453 : vector<1x2x32xf32> to vector<2x32xf32>
    %455 = vector.shape_cast %435 : vector<2x32xf32> to vector<1x2x32xf32>
    tpu.vector_store %arg14[%c1_181, %c0_182, %c0_183], %455 {strides = array<i32>} : memref<2x2x32xf32, #tpu.memory_space<vmem>>, vector<1x2x32xf32>,
    return
  }
  func.func @transform_0(%arg0: i32) -> (i32, i32) {
    %c0_i32 = arith.constant 0 : i32
    %c0_i32_0 = arith.constant 0 : i32
    %c0_i32_1 = arith.constant 0 : i32
    return %c0_i32, %c0_i32_0 : i32, i32
  }
  func.func @transform_1(%arg0: i32) -> (i32, i32) {
    %c0_i32 = arith.constant 0 : i32
    %c0_i32_0 = arith.constant 0 : i32
    %c0_i32_1 = arith.constant 0 : i32
    return %c0_i32, %c0_i32_0 : i32, i32
  }
  func.func @transform_2(%arg0: i32) -> (i32, i32) {
    %c0_i32 = arith.constant 0 : i32
    %c0_i32_0 = arith.constant 0 : i32
    %c0_i32_1 = arith.constant 0 : i32
    return %c0_i32, %c0_i32_0 : i32, i32
  }
  func.func @transform_3(%arg0: i32) -> (i32, i32) {
    %c0_i32 = arith.constant 0 : i32
    %c0_i32_0 = arith.constant 0 : i32
    %c0_i32_1 = arith.constant 0 : i32
    return %c0_i32, %c0_i32_0 : i32, i32
  }
  func.func @transform_4(%arg0: i32) -> (i32, i32, i32) {
    %c0_i32 = arith.constant 0 : i32
    %c0_i32_0 = arith.constant 0 : i32
    %c0_i32_1 = arith.constant 0 : i32
    %c0_i32_2 = arith.constant 0 : i32
    return %c0_i32, %c0_i32_0, %c0_i32_1 : i32, i32, i32
  }
  func.func @transform_5(%arg0: i32) -> (i32, i32, i32) {
    %c0_i32 = arith.constant 0 : i32
    %c0_i32_0 = arith.constant 0 : i32
    %c0_i32_1 = arith.constant 0 : i32
    %c0_i32_2 = arith.constant 0 : i32
    return %c0_i32, %c0_i32_0, %c0_i32_1 : i32, i32, i32
  }
  func.func @transform_6(%arg0: i32) -> (i32, i32, i32) {
    %c0_i32 = arith.constant 0 : i32
    %c0_i32_0 = arith.constant 0 : i32
    %c0_i32_1 = arith.constant 0 : i32
    %c0_i32_2 = arith.constant 0 : i32
    return %c0_i32, %c0_i32_0, %c0_i32_1 : i32, i32, i32
  }
  func.func @transform_7(%arg0: i32) -> (i32, i32, i32) {
    %c0_i32 = arith.constant 0 : i32
    %c0_i32_0 = arith.constant 0 : i32
    %c0_i32_1 = arith.constant 0 : i32
    %c0_i32_2 = arith.constant 0 : i32
    return %c0_i32, %c0_i32_0, %c0_i32_1 : i32, i32, i32
  }
  func.func @transform_8(%arg0: i32) -> (i32, i32, i32) {
    %c0_i32 = arith.constant 0 : i32
    %c0_i32_0 = arith.constant 0 : i32
    %c0_i32_1 = arith.constant 0 : i32
    %c0_i32_2 = arith.constant 0 : i32
    return %c0_i32, %c0_i32_0, %c0_i32_1 : i32, i32, i32
  }
  func.func @transform_9(%arg0: i32) -> (i32, i32) {
    %c0_i32 = arith.constant 0 : i32
    %c0_i32_0 = arith.constant 0 : i32
    %c0_i32_1 = arith.constant 0 : i32
    return %c0_i32, %c0_i32_0 : i32, i32
  }
  func.func @transform_10(%arg0: i32) -> (i32, i32) {
    %c0_i32 = arith.constant 0 : i32
    %c0_i32_0 = arith.constant 0 : i32
    %c0_i32_1 = arith.constant 0 : i32
    return %c0_i32, %c0_i32_0 : i32, i32
  }
  func.func @transform_11(%arg0: i32) -> (i32, i32) {
    %c0_i32 = arith.constant 0 : i32
    %c0_i32_0 = arith.constant 0 : i32
    %c0_i32_1 = arith.constant 0 : i32
    return %c0_i32, %c0_i32_0 : i32, i32
  }
  func.func @transform_12(%arg0: i32) -> (i32, i32, i32) {
    %c0_i32 = arith.constant 0 : i32
    %c0_i32_0 = arith.constant 0 : i32
    %c0_i32_1 = arith.constant 0 : i32
    %c0_i32_2 = arith.constant 0 : i32
    return %c0_i32, %c0_i32_0, %c0_i32_1 : i32, i32, i32
  }
  func.func @transform_13(%arg0: i32) -> (i32, i32, i32) {
    %c0_i32 = arith.constant 0 : i32
    %c0_i32_0 = arith.constant 0 : i32
    %c0_i32_1 = arith.constant 0 : i32
    %c0_i32_2 = arith.constant 0 : i32
    return %c0_i32, %c0_i32_0, %c0_i32_1 : i32, i32, i32
  }
}

</mosaic_0001>

<bundles_post_ra>
// kernel: tpu_custom_call.1
= control target key start
LH: loop header
LB: loop body
LE: loop exit
PB: predicated region body
PF: predicated region fallthrough
CT: control target
= control target key end

     0   :  { %19 = vsyncpa [#allocation3], 0  ;;  %v44_v0 = vlaneseq  ;;  %vm98_vm0 = vcmask 1041408   ;;  %s2759_s0 = inlined_call_operand.vmem [shape: s32[2,16], index: 0, kind: input, shape index: {}]   ;;  %s2760_s1 = inlined_call_operand.vmem [shape: f32[50,32], index: 1, kind: input, shape index: {}]   ;;  %s2761_s2 = inlined_call_operand.vmem [shape: f32[96,32], index: 2, kind: input, shape index: {}]   ;;  %s2762_s3 = inlined_call_operand.vmem [shape: f32[1,32], index: 3, kind: input, shape index: {}]   ;;  %s2763_s4 = inlined_call_operand.vmem [shape: f32[2,2,32], index: 4, kind: input, shape index: {}]   ;;  %s2764_s5 = inlined_call_operand.vmem [shape: f32[2,2,32], index: 5, kind: input, shape index: {}]   ;;  %s2765_s6 = inlined_call_operand.vmem [shape: f32[2,32,128], index: 6, kind: input, shape index: {}]   ;;  %s2766_s7 = inlined_call_operand.vmem [shape: f32[2,32,128], index: 7, kind: input, shape index: {}]   ;;  %s2767_s8 = inlined_call_operand.vmem [shape: f32[2,1,128], index: 8, kind: input, shape index: {}]   ;;  %s2768_s9 = inlined_call_operand.vmem [shape: f32[32,4], index: 9, kind: input, shape index: {}]   ;;  %s2769_s10 = inlined_call_operand.vmem [shape: f32[1,4], index: 10, kind: input, shape index: {}]   ;;  %s2770_s11 = inlined_call_operand.hbm [shape: f32[2,4], index: 11, kind: output, shape index: {0}]   ;;  %s2771_s12 = inlined_call_operand.hbm [shape: f32[2,2,32], index: 12, kind: output, shape index: {1}]   ;;  %s2772_s13 = inlined_call_operand.hbm [shape: f32[2,2,32], index: 13, kind: output, shape index: {2}]  }
   0x1   :  { %v90_v1 = vld [vmem:[%s2760_s1 + $0x30] sm:$0x3]  ;;  %v89_v2 = vld [vmem:[%s2760_s1 + $0x28] sm:$0xff]  ;;  %v88_v4 = vld [vmem:[%s2760_s1 + $0x20] sm:$0xff] }
   0x2   :  { %1824 = vmatpush.msk.msra.mxu0 %vm98_vm0, %v90_v1  ;;  %1827 = vmatpush.msk.msra.mxu1 %vm98_vm0, %v90_v1  ;;  %v48_v3 = vshrl.u32 %v44_v0, 7  ;;  %v87_v5 = vld [vmem:[%s2760_s1 + $0x18] sm:$0xff] }
   0x4   :  { %112 = vmatpush.msra.mxu0 %v89_v2  ;;  %184 = vmatpush.msra.mxu1 %v89_v2 }
   0x5   :  { %1914 = vset.pattern.permute.xlu1 %v48_v3  ;;  %1912 = vset.pattern.permute.xlu0 %v48_v3 }
   0x6   :  { %20 = vsyncpa [#allocation5], 0  ;;  %v43_v6 = vld [vmem:[%s2759_s0] sm:$0x3]  ;;  %113 = vmatpush.msra.mxu0 %v88_v4  ;;  %185 = vmatpush.msra.mxu1 %v88_v4  ;;  %v86_v7 = vld [vmem:[%s2760_s1 + $0x10] sm:$0xff]  ;;  %v55_v11 = vadd.s32 8, %v48_v3 }
   0x7   :  { %v59_v8 = vperm.slane %v43_v6, 1  ;;  %v46_v9 = vperm.slane %v43_v6, 0  ;;  %v85_v10 = vld [vmem:[%s2760_s1 + $0x8] sm:$0xff]  ;;  %v84_v12 = vld [vmem:[%s2760_s1] sm:$0xff]  ;;  %v45_v13 = vand.u32 127, %v44_v0  ;;  %vm91_vm1 = vcmask 408576  }
   0x8   :  { %114 = vmatpush.msra.mxu0 %v87_v5  ;;  %186 = vmatpush.msra.mxu1 %v87_v5  ;;  %v2129_v16 = vmov 0.0   ;;  %vm127_vm6 = vcmask 1040384   ;;  %v246_v31 = vld [vmem:[%s2761_s2 + $0x58] sm:$0xff]  ;;  %v245_v32 = vld [vmem:[%s2761_s2 + $0x50] sm:$0xff]  ;;  %v244_v38 = vld [vmem:[%s2761_s2 + $0x48] sm:$0xff]  ;;  %vm138_vm7 = vcmask 1046528  }
   0x9   :  { %268 = vmatpush.msra.mxu2 %v246_v31  ;;  %v243_v44 = vld [vmem:[%s2761_s2 + $0x40] sm:$0xff]  ;;  %s2130_s30 = smov 32   ;;  %v242_v49 = vld [vmem:[%s2761_s2 + $0x38] sm:$0xff]  ;;  %v241_v50 = vld [vmem:[%s2761_s2 + $0x30] sm:$0xff]  ;;  %vm150_vm8 = vcmask 1045504   ;;  %s2131_s20 = smov 64  }
   0xa   :  { %115 = vmatpush.msra.mxu0 %v86_v7  ;;  %187 = vmatpush.msra.mxu1 %v86_v7  ;;  %v240_v54 = vld [vmem:[%s2761_s2 + $0x28] sm:$0xff]  ;;  %v239_v0 = vld [vmem:[%s2761_s2 + $0x20] sm:$0xff]  ;;  %v238_v1 = vld [vmem:[%s2761_s2 + $0x18] sm:$0xff]  ;;  %vm162_vm9 = vcmask 261120   ;;  %vm165_vm10 = vcmask 523264   ;;  %vm251_vm11 = vcmask 785408  }
   0xb   :  { %269 = vmatpush.msra.mxu2 %v245_v32  ;;  %v237_v2 = vld [vmem:[%s2761_s2 + $0x10] sm:$0xff]  ;;  %v236_v3 = vld [vmem:[%s2761_s2 + $0x8] sm:$0xff]  ;;  %v235_v4 = vld [vmem:[%s2761_s2] sm:$0xff]  ;;  %vm429_vm12 = vcmask 1041409   ;;  %vm431_vm13 = vcmask 1042434   ;;  %vm433_vm14 = vcmask 1043459  }
   0xc   :  { %116 = vmatpush.msra.mxu0 %v85_v10  ;;  %188 = vmatpush.msra.mxu1 %v85_v10  ;;  %v2347_v31 = vld [vmem:[%s2766_s7 + $0x10] sm:$0xff]  ;;  %vm435_vm15 = vcmask 1044484   ;;  %vm437_vm0 = vcmask 1045509   ;;  %s2133_s15 = smov [#allocation4]   ;;  %s2134_s16 = smov 2  }
   0xd   :  { %64 = vperm.xlu1 %1914, %v59_v8   ;;  %51 = vperm.xlu0 %1912, %v46_v9   ;;  %s2135_s17 = smov [#allocation6]   ;;  %s1799_s21 = sshll.u32 %s2772_s13, 4  ;;  %s1800_s21 = int_to_ptr.hbm [resolvable:$true] %s1799_s21 }
   0xe   :  { %117 = vmatpush.msra.mxu0 %v84_v12  ;;  %189 = vmatpush.msra.mxu1 %v84_v12  ;;  %s2136_s22 = smov [#allocation2]   ;;  %s1776_s23 = sshll.u32 %s2770_s11, 4  ;;  %s1777_s23 = int_to_ptr.hbm [resolvable:$true] %s1776_s23 }
   0xf   :  { %270 = vmatpush.msra.mxu2 %v244_v38  ;;  %s1774_s1 = sshll.u32 %s2136_s22, 4  ;;  %s1775_s1 = int_to_ptr.vmem [resolvable:$true] %s1774_s1 }
  0x11   :  { %271 = vmatpush.msra.mxu2 %v243_v44  ;;  %v2357_v44 = vld [vmem:[%s2766_s7 + $0x8] sm:$0xff] }
  0x13   :  { %272 = vmatpush.msra.mxu2 %v242_v49 }
  0x15   :  { %1915 = vset.pattern.permute.xlu1 %v55_v11  ;;  %1913 = vset.pattern.permute.xlu0 %v55_v11 }
  0x16   :  { %273 = vmatpush.msra.mxu2 %v241_v50 }
  0x18   :  { %274 = vmatpush.msra.mxu2 %v240_v54 }
  0x1a   :  { %275 = vmatpush.msra.mxu2 %v239_v0 }
  0x1c   :  { %276 = vmatpush.msra.mxu2 %v238_v1  ;;  %v480_v1 = vld [vmem:[%s2764_s5] sm:$0x3] }
  0x1d   :  { %70 = vperm.xlu1 %1915, %v59_v8   ;;  %57 = vperm.xlu0 %1913, %v46_v9  }
  0x1e   :  { %277 = vmatpush.msra.mxu2 %v237_v2 }
  0x20   :  { %278 = vmatpush.msra.mxu2 %v236_v3 }
  0x22   :  { %279 = vmatpush.msra.mxu2 %v235_v4 }
  0x7f   :  { %v52_v14 = vpop.permute.xlu0 %51  ;;  %v65_v15 = vpop.permute.xlu1 %64 }
  0x80   :  { %vm72_vm2 = vcmp.eq.s32.totalorder %v52_v14, %v45_v13  ;;  %vm74_vm3 = vcmp.eq.s32.totalorder %v65_v15, %v45_v13 }
  0x81   :  { %v1820_v17 = vsel %vm72_vm2, 1.0, %v2129_v16  ;;  %v1822_v18 = vsel %vm74_vm3, 1.0, %v2129_v16  ;;  %vm441_vm2 = vcmask 1047559  }
  0x82   :  { %1825 = vmatmul.msk.f32.vlgmr.msra.gmra.mxu0 %vm91_vm1, %v1820_v17  ;;  %1828 = vmatmul.msk.f32.vlgmr.msra.gmra.mxu1 %vm91_vm1, %v1822_v18 }
  0x8f   :  { %v71_v19 = vpop.permute.xlu1 %70  ;;  %v58_v20 = vpop.permute.xlu0 %57 }
  0x90   :  { %vm75_vm4 = vcmp.eq.s32.totalorder %v71_v19, %v45_v13  ;;  %vm73_vm5 = vcmp.eq.s32.totalorder %v58_v20, %v45_v13 }
  0x91   :  { %v1823_v21 = vsel %vm75_vm4, 1.0, %v2129_v16  ;;  %v1821_v22 = vsel %vm73_vm5, 1.0, %v2129_v16 }
  0x92   :  { %1826 = vmatmul.msk.f32.gmra.mxu0 %vm91_vm1, %v1821_v22  ;;  %1829 = vmatmul.msk.f32.gmra.mxu1 %vm91_vm1, %v1823_v21  ;;  %v392_v21 = vld [vmem:[%s2765_s6 + $0x18] sm:$0xff]  ;;  %v391_v22 = vld [vmem:[%s2765_s6 + $0x10] sm:$0xff]  ;;  %vm439_vm1 = vcmask 1046534  }
  0x93   :  { %466 = vmatpush.msra.mxu3 %v392_v21 }
  0x95   :  { %467 = vmatpush.msra.mxu3 %v391_v22 }
  0xff   :  { %v191_v23 = vpop.f32.mrf.mxu1  ;;  %v119_v24 = vpop.f32.mrf.mxu0 }
 0x100   :  { %v128_v25 = vrot.slane %v119_v24, 7  ;;  %v199_v26 = vrot.slane %v191_v23, 7  ;;  %v2330_v23 = vld [vmem:[%s2762_s3] ss:$0 sm:$0xff]  ;;  %v390_v24 = vld [vmem:[%s2765_s6 + $0x8] sm:$0xff] }
 0x101   :  { %468 = vmatpush.msra.mxu3 %v390_v24 }
 0x102   :  { %v2242_v33 = vsel %vm127_vm6, 0.0, %v128_v25  ;;  %v2245_v34 = vsel %vm127_vm6, 0.0, %v199_v26 }
 0x103   :  { %v139_v40 = vrot.slane %v2242_v33, 1  ;;  %v209_v41 = vrot.slane %v2245_v34, 1  ;;  %v220_v55 = vrot.slane %v2245_v34, 2  ;;  %v151_v56 = vrot.slane %v2242_v33, 2 }
 0x10f   :  { %v122_v27 = vpop.f32.mrf.mxu0  ;;  %v194_v28 = vpop.f32.mrf.mxu1 }
 0x110   :  { %v129_v29 = vrot.slane %v122_v27, 7  ;;  %v200_v30 = vrot.slane %v194_v28, 7 }
 0x112   :  { %v2248_v35 = vsel %vm127_vm6, %v128_v25, %v129_v29  ;;  %v135_v36 = vsel %vm127_vm6, %v129_v29, 0.0  ;;  %v2252_v37 = vsel %vm127_vm6, %v199_v26, %v200_v30  ;;  %v206_v48 = vsel %vm127_vm6, %v200_v30, 0.0  ;;  %v389_v26 = vld [vmem:[%s2765_s6] sm:$0xff]  ;;  %v2342_v30 = vld [vmem:[%s2766_s7 + $0x18] sm:$0xff] }
 0x113   :  { %v142_v39 = vrot.slane %v135_v36, 1  ;;  %v210_v42 = vrot.slane %v2252_v37, 1  ;;  %v140_v43 = vrot.slane %v2248_v35, 1  ;;  %v223_v51 = vrot.slane %v206_v48, 2  ;;  %469 = vmatpush.msra.mxu3 %v389_v26  ;;  %1130 = vmatpush.msrb.mxu2 %v2342_v30 }
 0x114   :  { %v221_v52 = vrot.slane %v2252_v37, 2  ;;  %v152_v53 = vrot.slane %v2248_v35, 2  ;;  %v154_v60 = vrot.slane %v135_v36, 2  ;;  %v212_v62 = vrot.slane %v206_v48, 1 }
 0x115   :  { %v211_v45 = vsel %vm138_vm7, %v209_v41, %v210_v42  ;;  %v143_v46 = vsel %vm138_vm7, %v140_v43, %v142_v39  ;;  %v141_v47 = vsel %vm138_vm7, %v139_v40, %v140_v43  ;;  %506 = vmatpush.msrb.mxu3 %v2342_v30  ;;  %1131 = vmatpush.msrb.mxu2 %v2347_v31 }
 0x116   :  { %214 = vrot.lane.b32.xlu0 %v211_v45, %s2130_s30  ;;  %146 = vrot.lane.b32.xlu1 %v143_v46, %s2130_s30  ;;  %v224_v57 = vsel %vm150_vm8, %v221_v52, %v223_v51  ;;  %v222_v58 = vsel %vm150_vm8, %v220_v55, %v221_v52  ;;  %v153_v59 = vsel %vm150_vm8, %v151_v56, %v152_v53  ;;  %v2362_v45 = vld [vmem:[%s2766_s7] sm:$0xff] }
 0x117   :  { %144 = vrot.lane.b32.xlu2 %v141_v47, %s2130_s30  ;;  %v155_v61 = vsel %vm150_vm8, %v152_v53, %v154_v60  ;;  %v213_v63 = vsel %vm138_vm7, %v210_v42, %v212_v62  ;;  %507 = vmatpush.msrb.mxu3 %v2347_v31 }
 0x118   :  { %1132 = vmatpush.msrb.mxu2 %v2357_v44 }
 0x119   :  { %508 = vmatpush.msrb.mxu3 %v2357_v44 }
 0x11a   :  { %1133 = vmatpush.msrb.mxu2 %v2362_v45 }
 0x11b   :  { %509 = vmatpush.msrb.mxu3 %v2362_v45 }
 0x11e   :  { %227 = vrot.lane.b32.xlu0 %v224_v57, %s2131_s20  ;;  %225 = vrot.lane.b32.xlu1 %v222_v58, %s2131_s20 }
 0x11f   :  { %156 = vrot.lane.b32.xlu2 %v153_v59, %s2131_s20 }
 0x127   :  { %158 = vrot.lane.b32.xlu2 %v155_v61, %s2131_s20 }
 0x12f   :  { %216 = vrot.lane.b32.xlu2 %v213_v63, %s2130_s30 }
 0x137   :  { %536 = vrot.lane.b32.xlu2 %v480_v1, %s2130_s30 }
 0x171   :  { %v145_v5 = vpop.permute.xlu2 %144 }
 0x172   :  { %v163_v6 = vsel %vm162_vm9, %v2242_v33, %v145_v5 }
 0x179   :  { %v157_v7 = vpop.permute.xlu2 %156 }
 0x17a   :  { %v166_v8 = vsel %vm165_vm10, %v163_v6, %v157_v7 }
 0x17b   :  { %1830 = vmatmul.msk.f32.vlgmr.msra.gmra.mxu2 %vm251_vm11, %v166_v8 }
 0x181   :  { %v159_v10 = vpop.permute.xlu2 %158 }
 0x188   :  { %v147_v9 = vpop.permute.xlu1 %146  ;;  %v215_v13 = vpop.permute.xlu0 %214 }
 0x189   :  { %v164_v11 = vsel %vm162_vm9, %v2248_v35, %v147_v9  ;;  %v231_v14 = vsel %vm162_vm9, %v2245_v34, %v215_v13  ;;  %v217_v17 = vpop.permute.xlu2 %216 }
 0x18a   :  { %v167_v12 = vsel %vm165_vm10, %v164_v11, %v159_v10  ;;  %v232_v19 = vsel %vm162_vm9, %v2252_v37, %v217_v17 }
 0x18b   :  { %1831 = vmatmul.msk.f32.gmra.mxu2 %vm251_vm11, %v167_v12 }
 0x190   :  { %v226_v15 = vpop.permute.xlu1 %225  ;;  %v228_v18 = vpop.permute.xlu0 %227 }
 0x191   :  { %v233_v16 = vsel %vm165_vm10, %v231_v14, %v226_v15  ;;  %v234_v20 = vsel %vm165_vm10, %v232_v19, %v228_v18 }
 0x193   :  { %1832 = vmatmul.msk.f32.gmra.mxu2 %vm251_vm11, %v233_v16 }
 0x19b   :  { %1833 = vmatmul.msk.f32.gmra.mxu2 %vm251_vm11, %v234_v20 }
 0x1fe   :  { %v281_v25 = vpop.f32.mrf.mxu2 }
 0x1ff   :  { %v282_v27 = vadd.f32 %v2330_v23, %v281_v25 }
 0x201   :  { %v293_v28 = vmax.f32 %v282_v27, 0.0 }
 0x203   :  { %v301_v29 = vrot.slane %v293_v28, 2  ;;  %v302_v32 = vrot.slane %v293_v28, 4  ;;  %v1834_v34 = vrot.slane %v293_v28, 9  ;;  %v303_v35 = vrot.slane %v293_v28, 6 }
 0x205   :  { %v1835_v33 = vrot.slane %v301_v29, 9  ;;  %v1836_v36 = vrot.slane %v302_v32, 9  ;;  %v373_v38 = vmax.f32 %v293_v28, %v1834_v34  ;;  %v1837_v39 = vrot.slane %v303_v35, 9 }
 0x207   :  { %v374_v37 = vmax.f32 %v301_v29, %v1835_v33  ;;  %v375_v40 = vmax.f32 %v302_v32, %v1836_v36  ;;  %v413_v46 = vperm.slane %v373_v38, 0  ;;  %v376_v48 = vmax.f32 %v303_v35, %v1837_v39 }
 0x209   :  { %v414_v41 = vperm.slane %v374_v37, 0  ;;  %v415_v49 = vperm.slane %v375_v40, 0  ;;  %v416_v0 = vperm.slane %v376_v48, 0 }
 0x20b   :  { %v430_v50 = vsel %vm429_vm12, %v414_v41, %v413_v46 }
 0x20c   :  { %v432_v60 = vsel %vm431_vm13, %v415_v49, %v430_v50 }
 0x20d   :  { %v434_v5 = vsel %vm433_vm14, %v416_v0, %v432_v60 }
 0x20e   :  { %v284_v42 = vpop.f32.mrf.mxu2 }
 0x20f   :  { %v285_v43 = vadd.f32 %v2330_v23, %v284_v42 }
 0x211   :  { %v294_v47 = vmax.f32 %v285_v43, 0.0 }
 0x213   :  { %v1838_v51 = vrot.slane %v294_v47, 9  ;;  %v304_v52 = vrot.slane %v294_v47, 2  ;;  %v305_v53 = vrot.slane %v294_v47, 4  ;;  %v306_v54 = vrot.slane %v294_v47, 6 }
 0x215   :  { %v1839_v55 = vrot.slane %v304_v52, 9  ;;  %v1840_v56 = vrot.slane %v305_v53, 9  ;;  %v377_v57 = vmax.f32 %v294_v47, %v1838_v51  ;;  %v1841_v59 = vrot.slane %v306_v54, 9 }
 0x216   :  { %v287_v58 = vpop.f32.mrf.mxu2 }
 0x217   :  { %v288_v61 = vadd.f32 %v2330_v23, %v287_v58  ;;  %v378_v62 = vmax.f32 %v304_v52, %v1839_v55  ;;  %v379_v63 = vmax.f32 %v305_v53, %v1840_v56  ;;  %v417_v2 = vperm.slane %v377_v57, 0  ;;  %v477_v57 = vld [vmem:[%s2763_s4] sm:$0x3] }
 0x218   :  { %v380_v6 = vmax.f32 %v306_v54, %v1841_v59  ;;  %v1917_v59 = vld [vmem:[%s2767_s8] ss:$0 sm:$0xff] }
 0x219   :  { %v295_v3 = vmax.f32 %v288_v61, 0.0  ;;  %v418_v4 = vperm.slane %v378_v62, 0  ;;  %v419_v7 = vperm.slane %v379_v63, 0  ;;  %v436_v8 = vsel %vm435_vm15, %v417_v2, %v434_v5 }
 0x21a   :  { %v420_v18 = vperm.slane %v380_v6, 0 }
 0x21b   :  { %v307_v9 = vrot.slane %v295_v3, 2  ;;  %v308_v10 = vrot.slane %v295_v3, 4  ;;  %v309_v11 = vrot.slane %v295_v3, 6  ;;  %v1842_v12 = vrot.slane %v295_v3, 9 }
 0x21c   :  { %v438_v13 = vsel %vm437_vm0, %v418_v4, %v436_v8 }
 0x21d   :  { %v1843_v14 = vrot.slane %v307_v9, 9  ;;  %v1844_v15 = vrot.slane %v308_v10, 9  ;;  %v381_v16 = vmax.f32 %v295_v3, %v1842_v12  ;;  %v440_v19 = vsel %vm439_vm1, %v419_v7, %v438_v13 }
 0x21e   :  { %v290_v17 = vpop.f32.mrf.mxu2  ;;  %v1845_v20 = vrot.slane %v309_v11, 9  ;;  %v442_v25 = vsel %vm441_vm2, %v420_v18, %v440_v19 }
 0x21f   :  { %v382_v21 = vmax.f32 %v307_v9, %v1843_v14  ;;  %v383_v22 = vmax.f32 %v308_v10, %v1844_v15  ;;  %v291_v24 = vadd.f32 %v2330_v23, %v290_v17  ;;  %v421_v26 = vperm.slane %v381_v16, 0  ;;  %1850 = vmatmul.msk.f32.vlgmr.msra.gmra.mxu3 %vm162_vm9, %v442_v25 }
 0x220   :  { %677 = vmatpush.msra.mxu3 %v2342_v30  ;;  %v384_v32 = vmax.f32 %v309_v11, %v1845_v20 }
 0x221   :  { %v422_v27 = vperm.slane %v382_v21, 0  ;;  %v423_v28 = vperm.slane %v383_v22, 0  ;;  %v296_v29 = vmax.f32 %v291_v24, 0.0 }
 0x222   :  { %678 = vmatpush.msra.mxu3 %v2347_v31  ;;  %v424_v42 = vperm.slane %v384_v32, 0 }
 0x223   :  { %v443_v33 = vsel %vm429_vm12, %v422_v27, %v421_v26  ;;  %v1846_v34 = vrot.slane %v296_v29, 9  ;;  %v310_v35 = vrot.slane %v296_v29, 2  ;;  %v311_v36 = vrot.slane %v296_v29, 4 }
 0x224   :  { %v312_v37 = vrot.slane %v296_v29, 6  ;;  %v444_v23 = vsel %vm431_vm13, %v423_v28, %v443_v33  ;;  %679 = vmatpush.msra.mxu3 %v2357_v44 }
 0x225   :  { %v1847_v38 = vrot.slane %v310_v35, 9  ;;  %v1848_v39 = vrot.slane %v311_v36, 9  ;;  %v385_v41 = vmax.f32 %v296_v29, %v1846_v34  ;;  %v445_v49 = vsel %vm433_vm14, %v424_v42, %v444_v23 }
 0x226   :  { %v1849_v40 = vrot.slane %v312_v37, 9  ;;  %680 = vmatpush.msra.mxu3 %v2362_v45 }
 0x227   :  { %v386_v43 = vmax.f32 %v310_v35, %v1847_v38  ;;  %v387_v46 = vmax.f32 %v311_v36, %v1848_v39  ;;  %v425_v48 = vperm.slane %v385_v41, 0  ;;  %v537_v41 = vpop.permute.xlu2 %536 }
 0x228   :  { %v388_v47 = vmax.f32 %v312_v37, %v1849_v40 }
 0x229   :  { %v426_v50 = vperm.slane %v386_v43, 0  ;;  %v427_v51 = vperm.slane %v387_v46, 0  ;;  %v446_v52 = vsel %vm435_vm15, %v425_v48, %v445_v49  ;;  %v2436_v48 = vld [vmem:[%s2765_s6 + $0x38] sm:$0xff] }
 0x22a   :  { %v428_v53 = vperm.slane %v388_v47, 0  ;;  %v2441_v49 = vld [vmem:[%s2766_s7 + $0x38] sm:$0xff]  ;;  %583 = vmatpush.msrb.mxu0 %v2436_v48  ;;  %1344 = vmatpush.msra.mxu2 %v2436_v48 }
 0x22b   :  { %v447_v54 = vsel %vm437_vm0, %v426_v50, %v446_v52  ;;  %v2446_v50 = vld [vmem:[%s2765_s6 + $0x30] sm:$0xff]  ;;  %611 = vmatpush.msrb.mxu1 %v2441_v49  ;;  %v2458_v52 = vld [vmem:[%s2765_s6 + $0x28] sm:$0xff] }
 0x22c   :  { %v448_v55 = vsel %vm439_vm1, %v427_v51, %v447_v54  ;;  %v2453_v51 = vld [vmem:[%s2766_s7 + $0x30] sm:$0xff]  ;;  %584 = vmatpush.msrb.mxu0 %v2446_v50  ;;  %v2471_v54 = vld [vmem:[%s2765_s6 + $0x20] sm:$0xff]  ;;  %1345 = vmatpush.msra.mxu2 %v2446_v50 }
 0x22d   :  { %v449_v56 = vsel %vm441_vm2, %v428_v53, %v448_v55  ;;  %v2463_v53 = vld [vmem:[%s2766_s7 + $0x28] sm:$0xff]  ;;  %612 = vmatpush.msrb.mxu1 %v2453_v51 }
 0x22e   :  { %1851 = vmatmul.msk.f32.gmra.mxu3 %vm162_vm9, %v449_v56  ;;  %585 = vmatpush.msrb.mxu0 %v2458_v52 }
 0x22f   :  { %613 = vmatpush.msrb.mxu1 %v2463_v53  ;;  %1346 = vmatpush.msra.mxu2 %v2458_v52 }
 0x230   :  { %586 = vmatpush.msrb.mxu0 %v2471_v54 }
 0x231   :  { %1347 = vmatpush.msra.mxu2 %v2471_v54 }
 0x232   :  { %740 = vmatpush.msra.mxu0 %v2436_v48 }
 0x234   :  { %741 = vmatpush.msra.mxu0 %v2446_v50 }
 0x236   :  { %1854 = vmatmul.msk.f32.vlgmr.msrb.gmra.mxu3 %vm162_vm9, %v477_v57  ;;  %742 = vmatpush.msra.mxu0 %v2458_v52  ;;  %v2487_v57 = vld [vmem:[%s2766_s7 + $0x20] sm:$0xff] }
 0x237   :  { %828 = vmatpush.msrb.mxu3 %v2342_v30  ;;  %614 = vmatpush.msrb.mxu1 %v2487_v57 }
 0x238   :  { %743 = vmatpush.msra.mxu0 %v2471_v54 }
 0x239   :  { %829 = vmatpush.msrb.mxu3 %v2347_v31  ;;  %765 = vmatpush.msra.mxu1 %v2441_v49 }
 0x23b   :  { %830 = vmatpush.msrb.mxu3 %v2357_v44  ;;  %766 = vmatpush.msra.mxu1 %v2453_v51 }
 0x23d   :  { %831 = vmatpush.msrb.mxu3 %v2362_v45  ;;  %767 = vmatpush.msra.mxu1 %v2463_v53 }
 0x23f   :  { %768 = vmatpush.msra.mxu1 %v2487_v57 }
 0x2a2   :  { %v471_v58 = vpop.f32.mrf.mxu3 }
 0x2a3   :  { %v472_v60 = vadd.f32 %v1917_v59, %v471_v58  ;;  %v1852_v58 = vld [vmem:[%s2763_s4 + $0x2] sm:$0x3]  ;;  %s1786_s4 = sshll.u32 %s2771_s12, 4  ;;  %s1787_s4 = int_to_ptr.hbm [resolvable:$true] %s1786_s4 }
 0x2a4   :  { %1866 = vmatmul.msk.f32.vlgmr.msrb.gmra.mxu1 %vm162_vm9, %v1852_v58 }
 0x2a5   :  { %v662_v63 = vrot.slane %v472_v60, 1  ;;  %v811_v0 = vrot.slane %v472_v60, 2  ;;  %v962_v1 = vrot.slane %v472_v60, 3  ;;  %v1113_v2 = vrot.slane %v472_v60, 4  ;;  %916 = vmatpush.msrb.mxu1 %v2441_v49 }
 0x2a6   :  { %v1264_v3 = vrot.slane %v472_v60, 5  ;;  %v1415_v4 = vrot.slane %v472_v60, 6  ;;  %v1566_v5 = vrot.slane %v472_v60, 7 }
 0x2a7   :  { %917 = vmatpush.msrb.mxu1 %v2453_v51 }
 0x2a9   :  { %918 = vmatpush.msrb.mxu1 %v2463_v53 }
 0x2ab   :  { %919 = vmatpush.msrb.mxu1 %v2487_v57 }
 0x2b1   :  { %v474_v61 = vpop.f32.mrf.mxu3 }
 0x2b2   :  { %v475_v62 = vadd.f32 %v1917_v59, %v474_v61 }
 0x2b4   :  { %v484_v6 = vrot.slane %v475_v62, 7  ;;  %v2406_v7 = vsel %vm127_vm6, %v662_v63, %v475_v62  ;;  %v813_v8 = vrot.slane %v475_v62, 1  ;;  %v964_v9 = vrot.slane %v475_v62, 2 }
 0x2b5   :  { %v1115_v10 = vrot.slane %v475_v62, 3  ;;  %v1266_v11 = vrot.slane %v475_v62, 4  ;;  %v1417_v12 = vrot.slane %v475_v62, 5  ;;  %v1568_v13 = vrot.slane %v475_v62, 6 }
 0x2b6   :  { %v2409_v14 = vsel %vm127_vm6, %v811_v0, %v813_v8  ;;  %v2412_v15 = vsel %vm127_vm6, %v962_v1, %v964_v9  ;;  %v486_v20 = vsel %vm127_vm6, %v472_v60, %v484_v6  ;;  %v2515_v60 = vld [vmem:[%s2767_s8 + $0x1] ss:$0 sm:$0xff] }
 0x2b7   :  { %v2415_v16 = vsel %vm127_vm6, %v1113_v2, %v1115_v10  ;;  %v2418_v17 = vsel %vm127_vm6, %v1264_v3, %v1266_v11  ;;  %v2421_v18 = vsel %vm127_vm6, %v1415_v4, %v1417_v12  ;;  %v2424_v19 = vsel %vm127_vm6, %v1566_v5, %v1568_v13  ;;  %v1853_v5 = vld [vmem:[%s2764_s5 + $0x2] sm:$0x3]  ;;  %s1797_s5 = sshll.u32 %s2135_s17, 4  ;;  %s1798_s5 = int_to_ptr.vmem [resolvable:$true] %s1797_s5 }
 0x2b9   :  { %v511_v21 = vpop.f32.mrf.mxu3 }
 0x2ba   :  { %v514_v22 = vadd.f32 %v511_v21, %v486_v20 }
 0x2bc   :  { %1920 = vtanh.f32 %v514_v22  ;;  %v1855_v25 = vmul.f32 -1.442695, %v514_v22 }
 0x2be   :  { %1922 = vpow2.f32 %v1855_v25 }
 0x2c2   :  { %v1921_v24 = vpop.eup %1920 }
 0x2c3   :  { %541 = vrot.lane.b32.xlu1 %v1921_v24, %s2131_s20 }
 0x2c4   :  { %v1923_v26 = vpop.eup %1922 }
 0x2c5   :  { %v518_v27 = vadd.f32 1.0, %v1923_v26 }
 0x2c7   :  { %1924 = vrcp.f32 %v518_v27  ;;  %v530_v35 = vand.u32 2147483648, %v518_v27  ;;  %vm524_vm4 = vweird.f32 %v518_v27  ;;  %v528_v36 = vand.u32 2147483647, %v518_v27 }
 0x2c9   :  { %v531_v23 = vor.u32 1.1754944e-38, %v530_v35  ;;  %vm529_vm6 = vcmp.eq.f32.partialorder %v528_v36, 8.507059e+37 }
 0x2cd   :  { %v1925_v28 = vpop.eup %1924 }
 0x2ce   :  { %v520_v29 = vmul.f32 %v1925_v28, %v518_v27  ;;  %vm525_vm3 = vweird.f32 %v1925_v28 }
 0x2cf   :  { %vm526_vm5 = vmor %vm524_vm4, %vm525_vm3 }
 0x2d0   :  { %v521_v32 = vsub.f32 1.0, %v520_v29 }
 0x2d2   :  { %v522_v33 = vmul.f32 %v1925_v28, %v521_v32 }
 0x2d4   :  { %v523_v34 = vadd.f32 %v1925_v28, %v522_v33 }
 0x2d6   :  { %v527_v37 = vsel %vm526_vm5, %v1925_v28, %v523_v34 }
 0x2d7   :  { %v532_v38 = vsel %vm529_vm6, %v531_v23, %v527_v37 }
 0x2d8   :  { %v539_v42 = vmul.f32 %v537_v41, %v532_v38 }
 0x321   :  { %v616_v62 = vpop.f32.mrf.mxu1 }
 0x335   :  { %v542_v39 = vpop.permute.xlu1 %541 }
 0x336   :  { %v544_v40 = vmul.f32 %v542_v39, %v532_v38 }
 0x338   :  { %546 = vrot.lane.b32.xlu0 %v544_v40, %s2130_s30 }
 0x3aa   :  { %v547_v43 = vpop.permute.xlu0 %546 }
 0x3ab   :  { %v2429_v46 = vadd.f32 %v547_v43, %v539_v42 }
 0x3ad   :  { %1926 = vtanh.f32 %v2429_v46 }
 0x3b3   :  { %v1927_v47 = vpop.eup %1926 }
 0x3b4   :  { %552 = vrot.lane.b32.xlu1 %v1927_v47, %s2131_s20 }
 0x426   :  { %v553_v55 = vpop.permute.xlu1 %552 }
 0x427   :  { %v555_v56 = vmul.f32 %v553_v55, %v532_v38 }
 0x429   :  { %567 = vrot.lane.b32.xlu2 %v555_v56, %s2130_s30 }
 0x483   :  { %v568_v59 = vpop.permute.xlu2 %567 }
 0x484   :  { %1861 = vmatmul.msk.f32.vlgmr.msrb.gmra.mxu0 %vm162_vm9, %v568_v59  ;;  %1868 = vmatmul.msk.f32.vlgmr.msra.gmra.mxu3 %vm162_vm9, %v568_v59 }
 0x485   :  { %979 = vmatpush.msra.mxu3 %v2342_v30  ;;  %891 = vmatpush.msrb.mxu0 %v2436_v48 }
 0x487   :  { %980 = vmatpush.msra.mxu3 %v2347_v31  ;;  %892 = vmatpush.msrb.mxu0 %v2446_v50 }
 0x489   :  { %981 = vmatpush.msra.mxu3 %v2357_v44  ;;  %893 = vmatpush.msrb.mxu0 %v2458_v52 }
 0x48b   :  { %982 = vmatpush.msra.mxu3 %v2362_v45  ;;  %894 = vmatpush.msrb.mxu0 %v2471_v54 }
 0x501   :  { %v588_v61 = vpop.f32.mrf.mxu0 }
 0x502   :  { %v589_v63 = vadd.f32 %v2515_v60, %v588_v61 }
 0x504   :  { %v619_v0 = vadd.f32 %v616_v62, %v589_v63 }
 0x506   :  { %1928 = vtanh.f32 %v619_v0  ;;  %v1867_v6 = vmul.f32 -1.442695, %v619_v0 }
 0x507   :  { %v682_v1 = vpop.f32.mrf.mxu3 }
 0x508   :  { %v685_v2 = vadd.f32 %v682_v1, %v2406_v7 }
 0x50a   :  { %1930 = vtanh.f32 %v685_v2  ;;  %v1869_v8 = vmul.f32 -1.442695, %v685_v2 }
 0x50b   :  { %1932 = vpow2.f32 %v1867_v6 }
 0x50c   :  { %v1929_v3 = vpop.eup %1928  ;;  %1934 = vpow2.f32 %v1869_v8 }
 0x50d   :  { %646 = vrot.lane.b32.xlu1 %v1929_v3, %s2131_s20 }
 0x510   :  { %v1931_v4 = vpop.eup %1930 }
 0x511   :  { %708 = vrot.lane.b32.xlu0 %v1931_v4, %s2131_s20  ;;  %v1933_v9 = vpop.eup %1932 }
 0x512   :  { %v623_v10 = vadd.f32 1.0, %v1933_v9  ;;  %v1935_v7 = vpop.eup %1934 }
 0x513   :  { %v689_v11 = vadd.f32 1.0, %v1935_v7 }
 0x514   :  { %1936 = vrcp.f32 %v623_v10  ;;  %v635_v28 = vand.u32 2147483648, %v623_v10  ;;  %vm629_vm8 = vweird.f32 %v623_v10  ;;  %v633_v29 = vand.u32 2147483647, %v623_v10 }
 0x515   :  { %1938 = vrcp.f32 %v689_v11  ;;  %v701_v35 = vand.u32 2147483648, %v689_v11  ;;  %vm695_vm13 = vweird.f32 %v689_v11  ;;  %v699_v36 = vand.u32 2147483647, %v689_v11 }
 0x516   :  { %v636_v34 = vor.u32 1.1754944e-38, %v635_v28  ;;  %vm634_vm12 = vcmp.eq.f32.partialorder %v633_v29, 8.507059e+37 }
 0x517   :  { %v702_v40 = vor.u32 1.1754944e-38, %v701_v35  ;;  %vm700_vm15 = vcmp.eq.f32.partialorder %v699_v36, 8.507059e+37 }
 0x519   :  { %641 = vrot.lane.b32.xlu0 %v1853_v5, %s2130_s30 }
 0x51a   :  { %v1937_v12 = vpop.eup %1936 }
 0x51b   :  { %v625_v13 = vmul.f32 %v1937_v12, %v623_v10  ;;  %v1939_v20 = vpop.eup %1938  ;;  %vm630_vm7 = vweird.f32 %v1937_v12 }
 0x51c   :  { %v691_v22 = vmul.f32 %v1939_v20, %v689_v11  ;;  %vm631_vm10 = vmor %vm629_vm8, %vm630_vm7  ;;  %vm696_vm11 = vweird.f32 %v1939_v20 }
 0x51d   :  { %v626_v21 = vsub.f32 1.0, %v625_v13  ;;  %vm697_vm14 = vmor %vm695_vm13, %vm696_vm11 }
 0x51e   :  { %v692_v25 = vsub.f32 1.0, %v691_v22 }
 0x51f   :  { %v627_v24 = vmul.f32 %v1937_v12, %v626_v21 }
 0x520   :  { %v693_v27 = vmul.f32 %v1939_v20, %v692_v25 }
 0x521   :  { %v628_v26 = vadd.f32 %v1937_v12, %v627_v24 }
 0x522   :  { %v694_v33 = vadd.f32 %v1939_v20, %v693_v27 }
 0x523   :  { %v632_v32 = vsel %vm631_vm10, %v1937_v12, %v628_v26 }
 0x524   :  { %v637_v23 = vsel %vm634_vm12, %v636_v34, %v632_v32  ;;  %v698_v39 = vsel %vm697_vm14, %v1939_v20, %v694_v33 }
 0x525   :  { %v703_v42 = vsel %vm700_vm15, %v702_v40, %v698_v39 }
 0x526   :  { %v706_v47 = vmul.f32 %v703_v42, %v2429_v46 }
 0x57f   :  { %v647_v37 = vpop.permute.xlu1 %646 }
 0x580   :  { %v649_v38 = vmul.f32 %v647_v37, %v637_v23 }
 0x582   :  { %651 = vrot.lane.b32.xlu1 %v649_v38, %s2130_s30 }
 0x583   :  { %v709_v41 = vpop.permute.xlu0 %708 }
 0x584   :  { %v711_v43 = vmul.f32 %v709_v41, %v703_v42 }
 0x586   :  { %713 = vrot.lane.b32.xlu2 %v711_v43, %s2130_s30 }
 0x58b   :  { %v642_v59 = vpop.permute.xlu0 %641 }
 0x58c   :  { %v644_v61 = vmul.f32 %v642_v59, %v637_v23 }
 0x5e0   :  { %v714_v55 = vpop.permute.xlu2 %713 }
 0x5e1   :  { %v2528_v56 = vadd.f32 %v714_v55, %v706_v47 }
 0x5e3   :  { %1940 = vtanh.f32 %v2528_v56 }
 0x5e9   :  { %v1941_v58 = vpop.eup %1940 }
 0x5ea   :  { %719 = vrot.lane.b32.xlu2 %v1941_v58, %s2131_s20 }
 0x5f4   :  { %v652_v62 = vpop.permute.xlu1 %651 }
 0x5f5   :  { %v2532_v63 = vadd.f32 %v652_v62, %v644_v61 }
 0x5f7   :  { %1942 = vtanh.f32 %v2532_v63 }
 0x5fd   :  { %v1943_v0 = vpop.eup %1942 }
 0x5fe   :  { %657 = vrot.lane.b32.xlu0 %v1943_v0, %s2131_s20 }
 0x644   :  { %v720_v1 = vpop.permute.xlu2 %719 }
 0x645   :  { %v722_v46 = vmul.f32 %v720_v1, %v703_v42 }
 0x647   :  { %724 = vrot.lane.b32.xlu1 %v722_v46, %s2130_s30 }
 0x670   :  { %v658_v2 = vpop.permute.xlu0 %657 }
 0x671   :  { %v660_v3 = vmul.f32 %v658_v2, %v637_v23 }
 0x673   :  { %749 = vrot.lane.b32.xlu2 %v660_v3, %s2130_s30 }
 0x6b9   :  { %v725_v4 = vpop.permute.xlu1 %724 }
 0x6ba   :  { %1870 = vmatmul.msk.f32.vlgmr.msra.gmra.mxu0 %vm162_vm9, %v725_v4  ;;  %1873 = vmatmul.msk.f32.vlgmr.msrb.gmra.mxu3 %vm162_vm9, %v725_v4 }
 0x6bb   :  { %1042 = vmatpush.msra.mxu0 %v2436_v48  ;;  %1193 = vmatpush.msrb.mxu3 %v2436_v48 }
 0x6bd   :  { %1043 = vmatpush.msra.mxu0 %v2446_v50  ;;  %1194 = vmatpush.msrb.mxu3 %v2446_v50 }
 0x6bf   :  { %1044 = vmatpush.msra.mxu0 %v2458_v52  ;;  %1195 = vmatpush.msrb.mxu3 %v2458_v52 }
 0x6c1   :  { %1045 = vmatpush.msra.mxu0 %v2471_v54  ;;  %1196 = vmatpush.msrb.mxu3 %v2471_v54 }
 0x6cd   :  { %v750_v5 = vpop.permute.xlu2 %749 }
 0x6ce   :  { %1871 = vmatmul.msk.f32.vlgmr.msra.gmra.mxu1 %vm162_vm9, %v750_v5 }
 0x6cf   :  { %1067 = vmatpush.msra.mxu1 %v2441_v49 }
 0x6d1   :  { %1068 = vmatpush.msra.mxu1 %v2453_v51 }
 0x6d3   :  { %1069 = vmatpush.msra.mxu1 %v2463_v53 }
 0x6d5   :  { %1070 = vmatpush.msra.mxu1 %v2487_v57 }
 0x737   :  { %v745_v10 = vpop.f32.mrf.mxu0 }
 0x738   :  { %v746_v7 = vadd.f32 %v2515_v60, %v745_v10 }
 0x73d   :  { %v833_v6 = vpop.f32.mrf.mxu3 }
 0x73e   :  { %v836_v8 = vadd.f32 %v833_v6, %v2409_v14 }
 0x740   :  { %1944 = vtanh.f32 %v836_v8  ;;  %v1874_v20 = vmul.f32 -1.442695, %v836_v8 }
 0x746   :  { %v1945_v9 = vpop.eup %1944 }
 0x747   :  { %859 = vrot.lane.b32.xlu0 %v1945_v9, %s2131_s20 }
 0x74b   :  { %v770_v11 = vpop.f32.mrf.mxu1 }
 0x74c   :  { %v773_v12 = vadd.f32 %v770_v11, %v746_v7 }
 0x74e   :  { %1946 = vtanh.f32 %v773_v12  ;;  %v1872_v24 = vmul.f32 -1.442695, %v773_v12 }
 0x74f   :  { %1948 = vpow2.f32 %v1874_v20 }
 0x754   :  { %v1947_v13 = vpop.eup %1946 }
 0x755   :  { %796 = vrot.lane.b32.xlu1 %v1947_v13, %s2131_s20  ;;  %v1949_v21 = vpop.eup %1948 }
 0x756   :  { %v840_v22 = vadd.f32 1.0, %v1949_v21 }
 0x758   :  { %1950 = vrcp.f32 %v840_v22  ;;  %v852_v34 = vand.u32 2147483648, %v840_v22  ;;  %vm846_vm1 = vweird.f32 %v840_v22  ;;  %v850_v35 = vand.u32 2147483647, %v840_v22 }
 0x759   :  { %1952 = vpow2.f32 %v1872_v24 }
 0x75a   :  { %v853_v23 = vor.u32 1.1754944e-38, %v852_v34  ;;  %vm851_vm3 = vcmp.eq.f32.partialorder %v850_v35, 8.507059e+37 }
 0x75e   :  { %v1951_v14 = vpop.eup %1950 }
 0x75f   :  { %v1953_v25 = vpop.eup %1952  ;;  %v842_v26 = vmul.f32 %v1951_v14, %v840_v22  ;;  %vm847_vm0 = vweird.f32 %v1951_v14 }
 0x760   :  { %v777_v27 = vadd.f32 1.0, %v1953_v25  ;;  %vm848_vm2 = vmor %vm846_vm1, %vm847_vm0 }
 0x761   :  { %v843_v28 = vsub.f32 1.0, %v842_v26 }
 0x762   :  { %1954 = vrcp.f32 %v777_v27  ;;  %v789_v47 = vand.u32 2147483648, %v777_v27  ;;  %vm783_vm5 = vweird.f32 %v777_v27  ;;  %v787_v55 = vand.u32 2147483647, %v777_v27 }
 0x763   :  { %v844_v29 = vmul.f32 %v1951_v14, %v843_v28 }
 0x764   :  { %v790_v59 = vor.u32 1.1754944e-38, %v789_v47  ;;  %vm788_vm7 = vcmp.eq.f32.partialorder %v787_v55, 8.507059e+37 }
 0x765   :  { %v845_v33 = vadd.f32 %v1951_v14, %v844_v29 }
 0x767   :  { %v849_v37 = vsel %vm848_vm2, %v1951_v14, %v845_v33 }
 0x768   :  { %v1955_v32 = vpop.eup %1954  ;;  %v854_v39 = vsel %vm851_vm3, %v853_v23, %v849_v37 }
 0x769   :  { %v779_v36 = vmul.f32 %v1955_v32, %v777_v27  ;;  %vm784_vm4 = vweird.f32 %v1955_v32  ;;  %v857_v1 = vmul.f32 %v854_v39, %v2528_v56 }
 0x76a   :  { %vm785_vm6 = vmor %vm783_vm5, %vm784_vm4 }
 0x76b   :  { %v780_v38 = vsub.f32 1.0, %v779_v36 }
 0x76d   :  { %v781_v42 = vmul.f32 %v1955_v32, %v780_v38 }
 0x76f   :  { %v782_v43 = vadd.f32 %v1955_v32, %v781_v42 }
 0x771   :  { %v786_v58 = vsel %vm785_vm6, %v1955_v32, %v782_v43 }
 0x772   :  { %v791_v62 = vsel %vm788_vm7, %v790_v59, %v786_v58 }
 0x773   :  { %v794_v4 = vmul.f32 %v791_v62, %v2532_v63 }
 0x7b9   :  { %v860_v40 = vpop.permute.xlu0 %859 }
 0x7ba   :  { %v862_v41 = vmul.f32 %v860_v40, %v854_v39 }
 0x7bc   :  { %864 = vrot.lane.b32.xlu2 %v862_v41, %s2130_s30 }
 0x7c7   :  { %v797_v61 = vpop.permute.xlu1 %796 }
 0x7c8   :  { %v799_v0 = vmul.f32 %v797_v61, %v791_v62 }
 0x7ca   :  { %801 = vrot.lane.b32.xlu0 %v799_v0, %s2130_s30 }
 0x816   :  { %v865_v46 = vpop.permute.xlu2 %864 }
 0x817   :  { %v2560_v2 = vadd.f32 %v865_v46, %v857_v1 }
 0x819   :  { %1956 = vtanh.f32 %v2560_v2 }
 0x81f   :  { %v1957_v3 = vpop.eup %1956 }
 0x820   :  { %870 = vrot.lane.b32.xlu1 %v1957_v3, %s2131_s20 }
 0x83c   :  { %v802_v5 = vpop.permute.xlu0 %801 }
 0x83d   :  { %v2565_v6 = vadd.f32 %v802_v5, %v794_v4 }
 0x83f   :  { %1958 = vtanh.f32 %v2565_v6 }
 0x845   :  { %v1959_v8 = vpop.eup %1958 }
 0x846   :  { %807 = vrot.lane.b32.xlu2 %v1959_v8, %s2131_s20 }
 0x892   :  { %v871_v9 = vpop.permute.xlu1 %870 }
 0x893   :  { %v873_v56 = vmul.f32 %v871_v9, %v854_v39 }
 0x895   :  { %875 = vrot.lane.b32.xlu0 %v873_v56, %s2130_s30 }
 0x8a0   :  { %v808_v10 = vpop.permute.xlu2 %807 }
 0x8a1   :  { %v810_v7 = vmul.f32 %v808_v10, %v791_v62 }
 0x8a3   :  { %900 = vrot.lane.b32.xlu1 %v810_v7, %s2130_s30 }
 0x907   :  { %v876_v11 = vpop.permute.xlu0 %875 }
 0x908   :  { %1875 = vmatmul.msk.f32.vlgmr.msrb.gmra.mxu0 %vm162_vm9, %v876_v11  ;;  %1878 = vmatmul.msk.f32.vlgmr.msra.gmra.mxu3 %vm162_vm9, %v876_v11 }
 0x909   :  { %1218 = vmatpush.msrb.mxu0 %v2441_v49  ;;  %1369 = vmatpush.msra.mxu3 %v2441_v49 }
 0x90b   :  { %1219 = vmatpush.msrb.mxu0 %v2453_v51  ;;  %1370 = vmatpush.msra.mxu3 %v2453_v51 }
 0x90d   :  { %1220 = vmatpush.msrb.mxu0 %v2463_v53  ;;  %1371 = vmatpush.msra.mxu3 %v2463_v53 }
 0x90f   :  { %1221 = vmatpush.msrb.mxu0 %v2487_v57  ;;  %1372 = vmatpush.msra.mxu3 %v2487_v57 }
 0x915   :  { %v901_v63 = vpop.permute.xlu1 %900 }
 0x916   :  { %1876 = vmatmul.msk.f32.vlgmr.msrb.gmra.mxu1 %vm162_vm9, %v901_v63 }
 0x917   :  { %1281 = vmatpush.msrb.mxu1 %v2342_v30 }
 0x919   :  { %1282 = vmatpush.msrb.mxu1 %v2347_v31 }
 0x91b   :  { %1283 = vmatpush.msrb.mxu1 %v2357_v44 }
 0x91d   :  { %1284 = vmatpush.msrb.mxu1 %v2362_v45 }
 0x985   :  { %v896_v20 = vpop.f32.mrf.mxu0 }
 0x986   :  { %v897_v21 = vadd.f32 %v2515_v60, %v896_v20 }
 0x98b   :  { %v984_v12 = vpop.f32.mrf.mxu3 }
 0x98c   :  { %v987_v13 = vadd.f32 %v984_v12, %v2412_v15 }
 0x98e   :  { %1960 = vtanh.f32 %v987_v13  ;;  %v1879_v26 = vmul.f32 -1.442695, %v987_v13 }
 0x993   :  { %v921_v22 = vpop.f32.mrf.mxu1 }
 0x994   :  { %v1961_v24 = vpop.eup %1960  ;;  %v924_v14 = vadd.f32 %v921_v22, %v897_v21 }
 0x995   :  { %1010 = vrot.lane.b32.xlu2 %v1961_v24, %s2131_s20 }
 0x996   :  { %1962 = vtanh.f32 %v924_v14  ;;  %v1877_v33 = vmul.f32 -1.442695, %v924_v14 }
 0x997   :  { %1964 = vpow2.f32 %v1879_v26 }
 0x99c   :  { %v1963_v25 = vpop.eup %1962 }
 0x99d   :  { %947 = vrot.lane.b32.xlu0 %v1963_v25, %s2131_s20  ;;  %v1965_v27 = vpop.eup %1964 }
 0x99e   :  { %v991_v28 = vadd.f32 1.0, %v1965_v27 }
 0x9a0   :  { %1966 = vrcp.f32 %v991_v28  ;;  %v1003_v36 = vand.u32 2147483648, %v991_v28  ;;  %vm997_vm10 = vweird.f32 %v991_v28  ;;  %v1001_v37 = vand.u32 2147483647, %v991_v28 }
 0x9a1   :  { %1968 = vpow2.f32 %v1877_v33 }
 0x9a2   :  { %v1004_v39 = vor.u32 1.1754944e-38, %v1003_v36  ;;  %vm1002_vm12 = vcmp.eq.f32.partialorder %v1001_v37, 8.507059e+37 }
 0x9a6   :  { %v1967_v29 = vpop.eup %1966 }
 0x9a7   :  { %v993_v15 = vmul.f32 %v1967_v29, %v991_v28  ;;  %vm998_vm8 = vweird.f32 %v1967_v29  ;;  %v1969_v23 = vpop.eup %1968 }
 0x9a8   :  { %vm999_vm11 = vmor %vm997_vm10, %vm998_vm8  ;;  %v928_v40 = vadd.f32 1.0, %v1969_v23 }
 0x9a9   :  { %v994_v32 = vsub.f32 1.0, %v993_v15 }
 0x9aa   :  { %1970 = vrcp.f32 %v928_v40  ;;  %v940_v62 = vand.u32 2147483648, %v928_v40  ;;  %vm934_vm14 = vweird.f32 %v928_v40  ;;  %v938_v0 = vand.u32 2147483647, %v928_v40 }
 0x9ab   :  { %v995_v34 = vmul.f32 %v1967_v29, %v994_v32 }
 0x9ac   :  { %v941_v46 = vor.u32 1.1754944e-38, %v940_v62  ;;  %vm939_vm0 = vcmp.eq.f32.partialorder %v938_v0, 8.507059e+37 }
 0x9ad   :  { %v996_v35 = vadd.f32 %v1967_v29, %v995_v34 }
 0x9af   :  { %v1000_v38 = vsel %vm999_vm11, %v1967_v29, %v996_v35 }
 0x9b0   :  { %v1005_v42 = vsel %vm1002_vm12, %v1004_v39, %v1000_v38  ;;  %v1971_v47 = vpop.eup %1970 }
 0x9b1   :  { %v930_v55 = vmul.f32 %v1971_v47, %v928_v40  ;;  %vm935_vm13 = vweird.f32 %v1971_v47  ;;  %v1008_v8 = vmul.f32 %v1005_v42, %v2560_v2 }
 0x9b2   :  { %vm936_vm15 = vmor %vm934_vm14, %vm935_vm13 }
 0x9b3   :  { %v931_v58 = vsub.f32 1.0, %v930_v55 }
 0x9b5   :  { %v932_v59 = vmul.f32 %v1971_v47, %v931_v58 }
 0x9b7   :  { %v933_v61 = vadd.f32 %v1971_v47, %v932_v59 }
 0x9b9   :  { %v937_v1 = vsel %vm936_vm15, %v1971_v47, %v933_v61 }
 0x9ba   :  { %v942_v4 = vsel %vm939_vm0, %v941_v46, %v937_v1 }
 0x9bb   :  { %v945_v10 = vmul.f32 %v942_v4, %v2565_v6 }
 0x9ef   :  { %v1011_v41 = vpop.permute.xlu2 %1010 }
 0x9f0   :  { %v1013_v43 = vmul.f32 %v1011_v41, %v1005_v42 }
 0x9f2   :  { %1015 = vrot.lane.b32.xlu1 %v1013_v43, %s2130_s30 }
 0xa0f   :  { %v948_v3 = vpop.permute.xlu0 %947 }
 0xa10   :  { %v950_v5 = vmul.f32 %v948_v3, %v942_v4 }
 0xa12   :  { %952 = vrot.lane.b32.xlu2 %v950_v5, %s2130_s30 }
 0xa64   :  { %v1016_v9 = vpop.permute.xlu1 %1015 }
 0xa65   :  { %v2593_v56 = vadd.f32 %v1016_v9, %v1008_v8 }
 0xa67   :  { %1972 = vtanh.f32 %v2593_v56 }
 0xa6c   :  { %v953_v7 = vpop.permute.xlu2 %952 }
 0xa6d   :  { %v1973_v11 = vpop.eup %1972  ;;  %v2597_v63 = vadd.f32 %v953_v7, %v945_v10 }
 0xa6e   :  { %1021 = vrot.lane.b32.xlu0 %v1973_v11, %s2131_s20 }
 0xa6f   :  { %1974 = vtanh.f32 %v2597_v63 }
 0xa75   :  { %v1975_v12 = vpop.eup %1974 }
 0xa76   :  { %958 = vrot.lane.b32.xlu1 %v1975_v12, %s2131_s20 }
 0xae0   :  { %v1022_v13 = vpop.permute.xlu0 %1021 }
 0xae1   :  { %v1024_v2 = vmul.f32 %v1022_v13, %v1005_v42 }
 0xae3   :  { %1026 = vrot.lane.b32.xlu2 %v1024_v2, %s2130_s30 }
 0xae8   :  { %v959_v20 = vpop.permute.xlu1 %958 }
 0xae9   :  { %v961_v21 = vmul.f32 %v959_v20, %v942_v4 }
 0xaeb   :  { %1051 = vrot.lane.b32.xlu0 %v961_v21, %s2130_s30 }
 0xb3d   :  { %v1027_v6 = vpop.permute.xlu2 %1026 }
 0xb3e   :  { %1880 = vmatmul.msk.f32.vlgmr.msra.gmra.mxu0 %vm162_vm9, %v1027_v6  ;;  %1883 = vmatmul.msk.f32.vlgmr.msrb.gmra.mxu2 %vm162_vm9, %v1027_v6 }
 0xb3f   :  { %1432 = vmatpush.msra.mxu0 %v2342_v30  ;;  %1520 = vmatpush.msrb.mxu2 %v2441_v49 }
 0xb41   :  { %1433 = vmatpush.msra.mxu0 %v2347_v31  ;;  %1521 = vmatpush.msrb.mxu2 %v2453_v51 }
 0xb43   :  { %1434 = vmatpush.msra.mxu0 %v2357_v44  ;;  %1522 = vmatpush.msrb.mxu2 %v2463_v53 }
 0xb45   :  { %1435 = vmatpush.msra.mxu0 %v2362_v45  ;;  %1523 = vmatpush.msrb.mxu2 %v2487_v57 }
 0xb5d   :  { %v1052_v22 = vpop.permute.xlu0 %1051 }
 0xb5e   :  { %1881 = vmatmul.msk.f32.vlgmr.msra.gmra.mxu1 %vm162_vm9, %v1052_v22 }
 0xb5f   :  { %1495 = vmatpush.msra.mxu1 %v2436_v48 }
 0xb61   :  { %1496 = vmatpush.msra.mxu1 %v2446_v50 }
 0xb63   :  { %1497 = vmatpush.msra.mxu1 %v2458_v52 }
 0xb65   :  { %1498 = vmatpush.msra.mxu1 %v2471_v54 }
 0xbbb   :  { %v1047_v45 = vpop.f32.mrf.mxu0 }
 0xbbc   :  { %v1048_v24 = vadd.f32 %v2515_v60, %v1047_v45 }
 0xbc1   :  { %v1135_v30 = vpop.f32.mrf.mxu2 }
 0xbc2   :  { %v1138_v31 = vadd.f32 %v1135_v30, %v2415_v16  ;;  %v2048_v30 = vld [vmem:[%s2766_s7 + $0x18] sm:$0xff] }
 0xbc4   :  { %1976 = vtanh.f32 %v1138_v31  ;;  %v1884_v27 = vmul.f32 -1.442695, %v1138_v31  ;;  %v2049_v31 = vld [vmem:[%s2766_s7 + $0x10] sm:$0xff] }
 0xbca   :  { %v1977_v44 = vpop.eup %1976 }
 0xbcb   :  { %1161 = vrot.lane.b32.xlu1 %v1977_v44, %s2131_s20  ;;  %v2050_v44 = vld [vmem:[%s2766_s7 + $0x8] sm:$0xff] }
 0xbdb   :  { %v1072_v14 = vpop.f32.mrf.mxu1 }
 0xbdc   :  { %v1075_v25 = vadd.f32 %v1072_v14, %v1048_v24 }
 0xbde   :  { %1978 = vtanh.f32 %v1075_v25  ;;  %v1882_v28 = vmul.f32 -1.442695, %v1075_v25 }
 0xbdf   :  { %1980 = vpow2.f32 %v1884_v27 }
 0xbe0   :  { %1982 = vpow2.f32 %v1882_v28 }
 0xbe4   :  { %v1979_v26 = vpop.eup %1978 }
 0xbe5   :  { %1098 = vrot.lane.b32.xlu2 %v1979_v26, %s2131_s20  ;;  %v1981_v29 = vpop.eup %1980 }
 0xbe6   :  { %v1983_v15 = vpop.eup %1982  ;;  %v1142_v16 = vadd.f32 1.0, %v1981_v29 }
 0xbe7   :  { %v1079_v32 = vadd.f32 1.0, %v1983_v15 }
 0xbe8   :  { %1984 = vrcp.f32 %v1142_v16  ;;  %v1154_v41 = vand.u32 2147483648, %v1142_v16  ;;  %vm1148_vm2 = vweird.f32 %v1142_v16  ;;  %v1152_v42 = vand.u32 2147483647, %v1142_v16 }
 0xbe9   :  { %1986 = vrcp.f32 %v1079_v32  ;;  %v1091_v47 = vand.u32 2147483648, %v1079_v32  ;;  %vm1085_vm5 = vweird.f32 %v1079_v32  ;;  %v1089_v58 = vand.u32 2147483647, %v1079_v32 }
 0xbea   :  { %v1155_v59 = vor.u32 1.1754944e-38, %v1154_v41  ;;  %vm1153_vm7 = vcmp.eq.f32.partialorder %v1152_v42, 8.507059e+37 }
 0xbeb   :  { %v1092_v1 = vor.u32 1.1754944e-38, %v1091_v47  ;;  %vm1090_vm8 = vcmp.eq.f32.partialorder %v1089_v58, 8.507059e+37 }
 0xbee   :  { %v1985_v33 = vpop.eup %1984 }
 0xbef   :  { %v1987_v34 = vpop.eup %1986  ;;  %v1144_v35 = vmul.f32 %v1985_v33, %v1142_v16  ;;  %vm1149_vm1 = vweird.f32 %v1985_v33 }
 0xbf0   :  { %v1081_v36 = vmul.f32 %v1987_v34, %v1079_v32  ;;  %vm1086_vm3 = vweird.f32 %v1987_v34  ;;  %vm1150_vm4 = vmor %vm1148_vm2, %vm1149_vm1 }
 0xbf1   :  { %v1145_v37 = vsub.f32 1.0, %v1144_v35  ;;  %vm1087_vm6 = vmor %vm1085_vm5, %vm1086_vm3 }
 0xbf2   :  { %v1082_v23 = vsub.f32 1.0, %v1081_v36 }
 0xbf3   :  { %v1146_v38 = vmul.f32 %v1985_v33, %v1145_v37 }
 0xbf4   :  { %v1083_v39 = vmul.f32 %v1987_v34, %v1082_v23 }
 0xbf5   :  { %v1147_v40 = vadd.f32 %v1985_v33, %v1146_v38 }
 0xbf6   :  { %v1084_v43 = vadd.f32 %v1987_v34, %v1083_v39 }
 0xbf7   :  { %v1151_v55 = vsel %vm1150_vm4, %v1985_v33, %v1147_v40 }
 0xbf8   :  { %v1088_v61 = vsel %vm1087_vm6, %v1987_v34, %v1084_v43  ;;  %v1156_v62 = vsel %vm1153_vm7, %v1155_v59, %v1151_v55 }
 0xbf9   :  { %v1093_v4 = vsel %vm1090_vm8, %v1092_v1, %v1088_v61  ;;  %v1159_v8 = vmul.f32 %v1156_v62, %v2593_v56 }
 0xbfa   :  { %v1096_v7 = vmul.f32 %v1093_v4, %v2597_v63 }
 0xc3d   :  { %v1162_v0 = vpop.permute.xlu1 %1161 }
 0xc3e   :  { %v1164_v46 = vmul.f32 %v1162_v0, %v1156_v62 }
 0xc3f   :  { %v1099_v3 = vpop.permute.xlu2 %1098 }
 0xc40   :  { %v1101_v5 = vmul.f32 %v1099_v3, %v1093_v4  ;;  %1166 = vrot.lane.b32.xlu0 %v1164_v46, %s2130_s30 }
 0xc42   :  { %1103 = vrot.lane.b32.xlu1 %v1101_v5, %s2130_s30 }
 0xcb2   :  { %v1167_v9 = vpop.permute.xlu0 %1166 }
 0xcb3   :  { %v2626_v10 = vadd.f32 %v1167_v9, %v1159_v8 }
 0xcb4   :  { %v1104_v11 = vpop.permute.xlu1 %1103 }
 0xcb5   :  { %1988 = vtanh.f32 %v2626_v10  ;;  %v2630_v12 = vadd.f32 %v1104_v11, %v1096_v7 }
 0xcb7   :  { %1990 = vtanh.f32 %v2630_v12 }
 0xcbb   :  { %v1989_v13 = vpop.eup %1988 }
 0xcbc   :  { %1172 = vrot.lane.b32.xlu2 %v1989_v13, %s2131_s20 }
 0xcbd   :  { %v1991_v2 = vpop.eup %1990 }
 0xcbe   :  { %1109 = vrot.lane.b32.xlu0 %v1991_v2, %s2131_s20 }
 0xd16   :  { %v1173_v20 = vpop.permute.xlu2 %1172 }
 0xd17   :  { %v1175_v56 = vmul.f32 %v1173_v20, %v1156_v62 }
 0xd19   :  { %1177 = vrot.lane.b32.xlu1 %v1175_v56, %s2130_s30 }
 0xd30   :  { %v1110_v21 = vpop.permute.xlu0 %1109 }
 0xd31   :  { %v1112_v6 = vmul.f32 %v1110_v21, %v1093_v4 }
 0xd33   :  { %1202 = vrot.lane.b32.xlu2 %v1112_v6, %s2130_s30 }
 0xd8b   :  { %v1178_v63 = vpop.permute.xlu1 %1177 }
 0xd8c   :  { %1885 = vmatmul.msk.f32.vlgmr.msrb.gmra.mxu3 %vm162_vm9, %v1178_v63  ;;  %1888 = vmatmul.msk.f32.vlgmr.msrb.gmra.mxu1 %vm162_vm9, %v1178_v63 }
 0xd8d   :  { %v1203_v22 = vpop.permute.xlu2 %1202  ;;  %1583 = vmatpush.msrb.mxu3 %v2048_v30  ;;  %1671 = vmatpush.msrb.mxu1 %v2441_v49  ;;  %v2051_v49 = vld [vmem:[%s2766_s7] sm:$0xff] }
 0xd8e   :  { %1886 = vmatmul.msk.f32.vlgmr.msrb.gmra.mxu0 %vm162_vm9, %v1203_v22 }
 0xd8f   :  { %1584 = vmatpush.msrb.mxu3 %v2049_v31  ;;  %1646 = vmatpush.msrb.mxu0 %v2436_v48 }
 0xd90   :  { %1672 = vmatpush.msrb.mxu1 %v2453_v51 }
 0xd91   :  { %1585 = vmatpush.msrb.mxu3 %v2050_v44  ;;  %1647 = vmatpush.msrb.mxu0 %v2446_v50 }
 0xd92   :  { %1673 = vmatpush.msrb.mxu1 %v2463_v53 }
 0xd93   :  { %1586 = vmatpush.msrb.mxu3 %v2051_v49  ;;  %1648 = vmatpush.msrb.mxu0 %v2458_v52 }
 0xd94   :  { %1674 = vmatpush.msrb.mxu1 %v2487_v57 }
 0xd95   :  { %1649 = vmatpush.msrb.mxu0 %v2471_v54 }
 0xe09   :  { %v1286_v48 = vpop.f32.mrf.mxu1 }
 0xe0a   :  { %v1289_v51 = vadd.f32 %v1286_v48, %v2418_v17 }
 0xe0b   :  { %v1223_v24 = vpop.f32.mrf.mxu0 }
 0xe0c   :  { %1992 = vtanh.f32 %v1289_v51  ;;  %v1889_v52 = vmul.f32 -1.442695, %v1289_v51 }
 0xe0f   :  { %v1198_v45 = vpop.f32.mrf.mxu3 }
 0xe10   :  { %v1199_v50 = vadd.f32 %v2515_v60, %v1198_v45 }
 0xe12   :  { %v1993_v53 = vpop.eup %1992  ;;  %v1226_v14 = vadd.f32 %v1223_v24, %v1199_v50 }
 0xe13   :  { %1312 = vrot.lane.b32.xlu0 %v1993_v53, %s2131_s20 }
 0xe14   :  { %1994 = vtanh.f32 %v1226_v14  ;;  %v1887_v57 = vmul.f32 -1.442695, %v1226_v14 }
 0xe15   :  { %1996 = vpow2.f32 %v1889_v52 }
 0xe16   :  { %1998 = vpow2.f32 %v1887_v57 }
 0xe1a   :  { %v1995_v25 = vpop.eup %1994 }
 0xe1b   :  { %1249 = vrot.lane.b32.xlu1 %v1995_v25, %s2131_s20  ;;  %v1997_v54 = vpop.eup %1996 }
 0xe1c   :  { %v1293_v26 = vadd.f32 1.0, %v1997_v54  ;;  %v1999_v17 = vpop.eup %1998 }
 0xe1d   :  { %v1230_v27 = vadd.f32 1.0, %v1999_v17 }
 0xe1e   :  { %2000 = vrcp.f32 %v1293_v26  ;;  %v1305_v36 = vand.u32 2147483648, %v1293_v26  ;;  %vm1299_vm11 = vweird.f32 %v1293_v26  ;;  %v1303_v37 = vand.u32 2147483647, %v1293_v26 }
 0xe1f   :  { %2002 = vrcp.f32 %v1230_v27  ;;  %v1242_v47 = vand.u32 2147483648, %v1230_v27  ;;  %vm1236_vm15 = vweird.f32 %v1230_v27  ;;  %v1240_v55 = vand.u32 2147483647, %v1230_v27 }
 0xe20   :  { %v1306_v39 = vor.u32 1.1754944e-38, %v1305_v36  ;;  %vm1304_vm13 = vcmp.eq.f32.partialorder %v1303_v37, 8.507059e+37 }
 0xe21   :  { %v1243_v59 = vor.u32 1.1754944e-38, %v1242_v47  ;;  %vm1241_vm1 = vcmp.eq.f32.partialorder %v1240_v55, 8.507059e+37 }
 0xe24   :  { %v2001_v28 = vpop.eup %2000 }
 0xe25   :  { %v1295_v29 = vmul.f32 %v2001_v28, %v1293_v26  ;;  %v2003_v16 = vpop.eup %2002  ;;  %vm1300_vm10 = vweird.f32 %v2001_v28 }
 0xe26   :  { %v1232_v33 = vmul.f32 %v2003_v16, %v1230_v27  ;;  %vm1301_vm12 = vmor %vm1299_vm11, %vm1300_vm10  ;;  %vm1237_vm14 = vweird.f32 %v2003_v16 }
 0xe27   :  { %v1296_v15 = vsub.f32 1.0, %v1295_v29  ;;  %vm1238_vm0 = vmor %vm1236_vm15, %vm1237_vm14 }
 0xe28   :  { %v1233_v35 = vsub.f32 1.0, %v1232_v33 }
 0xe29   :  { %v1297_v32 = vmul.f32 %v2001_v28, %v1296_v15 }
 0xe2a   :  { %v1234_v38 = vmul.f32 %v2003_v16, %v1233_v35 }
 0xe2b   :  { %v1298_v34 = vadd.f32 %v2001_v28, %v1297_v32 }
 0xe2c   :  { %v1235_v43 = vadd.f32 %v2003_v16, %v1234_v38 }
 0xe2d   :  { %v1302_v23 = vsel %vm1301_vm12, %v2001_v28, %v1298_v34 }
 0xe2e   :  { %v1307_v41 = vsel %vm1304_vm13, %v1306_v39, %v1302_v23  ;;  %v1239_v58 = vsel %vm1238_vm0, %v2003_v16, %v1235_v43 }
 0xe2f   :  { %v1244_v62 = vsel %vm1241_vm1, %v1243_v59, %v1239_v58  ;;  %v1310_v1 = vmul.f32 %v1307_v41, %v2626_v10 }
 0xe30   :  { %v1247_v5 = vmul.f32 %v1244_v62, %v2630_v12 }
 0xe85   :  { %v1313_v40 = vpop.permute.xlu0 %1312 }
 0xe86   :  { %v1315_v42 = vmul.f32 %v1313_v40, %v1307_v41 }
 0xe88   :  { %1317 = vrot.lane.b32.xlu2 %v1315_v42, %s2130_s30 }
 0xe8d   :  { %v1250_v61 = vpop.permute.xlu1 %1249 }
 0xe8e   :  { %v1252_v0 = vmul.f32 %v1250_v61, %v1244_v62 }
 0xe90   :  { %1254 = vrot.lane.b32.xlu0 %v1252_v0, %s2130_s30 }
 0xee2   :  { %v1318_v46 = vpop.permute.xlu2 %1317 }
 0xee3   :  { %v2667_v3 = vadd.f32 %v1318_v46, %v1310_v1 }
 0xee5   :  { %2004 = vtanh.f32 %v2667_v3 }
 0xeeb   :  { %v2005_v4 = vpop.eup %2004 }
 0xeec   :  { %1323 = vrot.lane.b32.xlu1 %v2005_v4, %s2131_s20 }
 0xf02   :  { %v1255_v8 = vpop.permute.xlu0 %1254 }
 0xf03   :  { %v2672_v9 = vadd.f32 %v1255_v8, %v1247_v5 }
 0xf05   :  { %2006 = vtanh.f32 %v2672_v9 }
 0xf0b   :  { %v2007_v7 = vpop.eup %2006 }
 0xf0c   :  { %1260 = vrot.lane.b32.xlu2 %v2007_v7, %s2131_s20  ;;  %v2707_v7 = vld [vmem:[%s2767_s8 + $0x1] ss:$0 sm:$0xff]  ;;  %s2132_s8 = smov 96  }
 0xf5e   :  { %v1324_v11 = vpop.permute.xlu1 %1323 }
 0xf5f   :  { %v1326_v10 = vmul.f32 %v1324_v11, %v1307_v41 }
 0xf61   :  { %1328 = vrot.lane.b32.xlu0 %v1326_v10, %s2130_s30 }
 0xf66   :  { %v1261_v13 = vpop.permute.xlu2 %1260 }
 0xf67   :  { %v1263_v2 = vmul.f32 %v1261_v13, %v1244_v62 }
 0xf69   :  { %1353 = vrot.lane.b32.xlu1 %v1263_v2, %s2130_s30 }
 0xfd3   :  { %v1329_v20 = vpop.permute.xlu0 %1328 }
 0xfd4   :  { %1890 = vmatmul.msk.f32.vlgmr.msra.gmra.mxu2 %vm162_vm9, %v1329_v20  ;;  %1893 = vmatmul.msk.f32.vlgmr.msra.gmra.mxu0 %vm162_vm9, %v1329_v20 }
 0xfdb   :  { %v1354_v12 = vpop.permute.xlu1 %1353 }
 0xfdc   :  { %1891 = vmatmul.msk.f32.vlgmr.msra.gmra.mxu3 %vm162_vm9, %v1354_v12 }
0x1051   :  { %v1437_v56 = vpop.f32.mrf.mxu0 }
0x1052   :  { %v1440_v21 = vadd.f32 %v1437_v56, %v2421_v18 }
0x1054   :  { %2008 = vtanh.f32 %v1440_v21  ;;  %v1894_v49 = vmul.f32 -1.442695, %v1440_v21 }
0x1057   :  { %v1349_v63 = vpop.f32.mrf.mxu2 }
0x1058   :  { %v1350_v22 = vadd.f32 %v2515_v60, %v1349_v63 }
0x105a   :  { %v2009_v6 = vpop.eup %2008 }
0x105b   :  { %1463 = vrot.lane.b32.xlu2 %v2009_v6, %s2131_s20 }
0x105f   :  { %v1374_v30 = vpop.f32.mrf.mxu3 }
0x1060   :  { %v1377_v31 = vadd.f32 %v1374_v30, %v1350_v22 }
0x1062   :  { %2010 = vtanh.f32 %v1377_v31  ;;  %v1892_v53 = vmul.f32 -1.442695, %v1377_v31 }
0x1063   :  { %2012 = vpow2.f32 %v1894_v49 }
0x1068   :  { %v2011_v44 = vpop.eup %2010 }
0x1069   :  { %1400 = vrot.lane.b32.xlu0 %v2011_v44, %s2131_s20  ;;  %v2013_v48 = vpop.eup %2012 }
0x106a   :  { %v1444_v51 = vadd.f32 1.0, %v2013_v48 }
0x106c   :  { %2014 = vrcp.f32 %v1444_v51  ;;  %v1456_v25 = vand.u32 2147483648, %v1444_v51  ;;  %vm1450_vm3 = vweird.f32 %v1444_v51  ;;  %v1454_v60 = vand.u32 2147483647, %v1444_v51 }
0x106d   :  { %2016 = vpow2.f32 %v1892_v53 }
0x106e   :  { %v1457_v57 = vor.u32 1.1754944e-38, %v1456_v25  ;;  %vm1455_vm5 = vcmp.eq.f32.partialorder %v1454_v60, 8.507059e+37 }
0x1072   :  { %v2015_v45 = vpop.eup %2014 }
0x1073   :  { %v1446_v18 = vmul.f32 %v2015_v45, %v1444_v51  ;;  %vm1451_vm2 = vweird.f32 %v2015_v45  ;;  %v2017_v27 = vpop.eup %2016 }
0x1074   :  { %vm1452_vm4 = vmor %vm1450_vm3, %vm1451_vm2  ;;  %v1381_v28 = vadd.f32 1.0, %v2017_v27  ;;  %vm1753_vm3 = vcmask 254976  }
0x1075   :  { %v1447_v50 = vsub.f32 1.0, %v1446_v18 }
0x1076   :  { %2018 = vrcp.f32 %v1381_v28  ;;  %v1393_v34 = vand.u32 2147483648, %v1381_v28  ;;  %vm1387_vm7 = vweird.f32 %v1381_v28  ;;  %v1391_v35 = vand.u32 2147483647, %v1381_v28 }
0x1077   :  { %v1448_v24 = vmul.f32 %v2015_v45, %v1447_v50 }
0x1078   :  { %v1394_v37 = vor.u32 1.1754944e-38, %v1393_v34  ;;  %vm1392_vm10 = vcmp.eq.f32.partialorder %v1391_v35, 8.507059e+37 }
0x1079   :  { %v1449_v14 = vadd.f32 %v2015_v45, %v1448_v24 }
0x107b   :  { %v1453_v52 = vsel %vm1452_vm4, %v2015_v45, %v1449_v14 }
0x107c   :  { %v1458_v54 = vsel %vm1455_vm5, %v1457_v57, %v1453_v52  ;;  %v2019_v29 = vpop.eup %2018 }
0x107d   :  { %v1383_v15 = vmul.f32 %v2019_v29, %v1381_v28  ;;  %vm1388_vm6 = vweird.f32 %v2019_v29  ;;  %v1461_v40 = vmul.f32 %v1458_v54, %v2667_v3 }
0x107e   :  { %vm1389_vm8 = vmor %vm1387_vm7, %vm1388_vm6 }
0x107f   :  { %v1384_v16 = vsub.f32 1.0, %v1383_v15 }
0x1081   :  { %v1385_v32 = vmul.f32 %v2019_v29, %v1384_v16 }
0x1083   :  { %v1386_v33 = vadd.f32 %v2019_v29, %v1385_v32 }
0x1085   :  { %v1390_v36 = vsel %vm1389_vm8, %v2019_v29, %v1386_v33 }
0x1086   :  { %v1395_v38 = vsel %vm1392_vm10, %v1394_v37, %v1390_v36 }
0x1087   :  { %v1398_v47 = vmul.f32 %v1395_v38, %v2672_v9 }
0x10b5   :  { %v1464_v26 = vpop.permute.xlu2 %1463 }
0x10b6   :  { %v1466_v17 = vmul.f32 %v1464_v26, %v1458_v54 }
0x10b8   :  { %1468 = vrot.lane.b32.xlu1 %v1466_v17, %s2130_s30 }
0x10db   :  { %v1401_v23 = vpop.permute.xlu0 %1400 }
0x10dc   :  { %v1403_v39 = vmul.f32 %v1401_v23, %v1395_v38 }
0x10de   :  { %1405 = vrot.lane.b32.xlu2 %v1403_v39, %s2130_s30 }
0x112a   :  { %v1469_v41 = vpop.permute.xlu1 %1468 }
0x112b   :  { %v2688_v42 = vadd.f32 %v1469_v41, %v1461_v40 }
0x112d   :  { %2020 = vtanh.f32 %v2688_v42 }
0x1133   :  { %v2021_v43 = vpop.eup %2020 }
0x1134   :  { %1474 = vrot.lane.b32.xlu0 %v2021_v43, %s2131_s20 }
0x1138   :  { %v1406_v55 = vpop.permute.xlu2 %1405 }
0x1139   :  { %v2693_v58 = vadd.f32 %v1406_v55, %v1398_v47 }
0x113b   :  { %2022 = vtanh.f32 %v2693_v58 }
0x1141   :  { %v2023_v59 = vpop.eup %2022 }
0x1142   :  { %1411 = vrot.lane.b32.xlu1 %v2023_v59, %s2131_s20 }
0x11a6   :  { %v1475_v61 = vpop.permute.xlu0 %1474 }
0x11a7   :  { %v1477_v62 = vmul.f32 %v1475_v61, %v1458_v54 }
0x11a9   :  { %1479 = vrot.lane.b32.xlu2 %v1477_v62, %s2130_s30 }
0x11b4   :  { %v1412_v0 = vpop.permute.xlu1 %1411 }
0x11b5   :  { %v1414_v1 = vmul.f32 %v1412_v0, %v1395_v38 }
0x11b7   :  { %1504 = vrot.lane.b32.xlu0 %v1414_v1, %s2130_s30 }
0x1203   :  { %v1480_v46 = vpop.permute.xlu2 %1479 }
0x1204   :  { %1895 = vmatmul.msk.f32.vlgmr.msra.gmra.mxu1 %vm162_vm9, %v1480_v46  ;;  %1898 = vmatmul.msk.f32.vlgmr.msrb.gmra.mxu3 %vm162_vm9, %v1480_v46 }
0x1229   :  { %v1505_v3 = vpop.permute.xlu0 %1504 }
0x122a   :  { %1896 = vmatmul.msk.f32.vlgmr.msrb.gmra.mxu2 %vm162_vm9, %v1505_v3 }
0x1281   :  { %v1500_v9 = vpop.f32.mrf.mxu1 }
0x1282   :  { %v1501_v11 = vadd.f32 %v2707_v7, %v1500_v9 }
0x1287   :  { %v1588_v4 = vpop.f32.mrf.mxu3 }
0x1288   :  { %v1591_v5 = vadd.f32 %v1588_v4, %v2424_v19 }
0x128a   :  { %2024 = vtanh.f32 %v1591_v5  ;;  %v1899_v20 = vmul.f32 -1.442695, %v1591_v5 }
0x1290   :  { %v2025_v8 = vpop.eup %2024 }
0x1291   :  { %1614 = vrot.lane.b32.xlu1 %v2025_v8, %s2131_s20 }
0x12ad   :  { %v1525_v10 = vpop.f32.mrf.mxu2 }
0x12ae   :  { %v1528_v13 = vadd.f32 %v1525_v10, %v1501_v11 }
0x12b0   :  { %2026 = vtanh.f32 %v1528_v13  ;;  %v1897_v56 = vmul.f32 -1.442695, %v1528_v13 }
0x12b1   :  { %2028 = vpow2.f32 %v1899_v20 }
0x12b6   :  { %v2027_v2 = vpop.eup %2026 }
0x12b7   :  { %1551 = vrot.lane.b32.xlu2 %v2027_v2, %s2131_s20  ;;  %v2029_v19 = vpop.eup %2028 }
0x12b8   :  { %v1595_v12 = vadd.f32 1.0, %v2029_v19 }
0x12ba   :  { %2030 = vrcp.f32 %v1595_v12  ;;  %v1607_v48 = vand.u32 2147483648, %v1595_v12  ;;  %vm1601_vm12 = vweird.f32 %v1595_v12  ;;  %v1605_v51 = vand.u32 2147483647, %v1595_v12 }
0x12bb   :  { %2032 = vpow2.f32 %v1897_v56 }
0x12bc   :  { %v1608_v50 = vor.u32 1.1754944e-38, %v1607_v48  ;;  %vm1606_vm14 = vcmp.eq.f32.partialorder %v1605_v51, 8.507059e+37  ;;  %v1919_v51 = vld [vmem:[%s2769_s10] ss:$0 sm:$0xff] }
0x12c0   :  { %v2031_v21 = vpop.eup %2030 }
0x12c1   :  { %v2033_v6 = vpop.eup %2032  ;;  %v1597_v63 = vmul.f32 %v2031_v21, %v1595_v12  ;;  %vm1602_vm11 = vweird.f32 %v2031_v21 }
0x12c2   :  { %v1532_v22 = vadd.f32 1.0, %v2033_v6  ;;  %vm1603_vm13 = vmor %vm1601_vm12, %vm1602_vm11  ;;  %v1720_v6 = vld [vmem:[%s2768_s9 + $0x18] sm:$0xff] }
0x12c3   :  { %v1598_v30 = vsub.f32 1.0, %v1597_v63  ;;  %v1719_v63 = vld [vmem:[%s2768_s9 + $0x10] sm:$0xff]  ;;  %1742 = vmatpush.msra.mxu2 %v1720_v6 }
0x12c4   :  { %2034 = vrcp.f32 %v1532_v22  ;;  %v1544_v57 = vand.u32 2147483648, %v1532_v22  ;;  %vm1538_vm0 = vweird.f32 %v1532_v22  ;;  %v1542_v54 = vand.u32 2147483647, %v1532_v22 }
0x12c5   :  { %v1599_v31 = vmul.f32 %v2031_v21, %v1598_v30  ;;  %1743 = vmatpush.msra.mxu2 %v1719_v63  ;;  %v1717_v30 = vld [vmem:[%s2768_s9] sm:$0xff] }
0x12c6   :  { %v1545_v17 = vor.u32 1.1754944e-38, %v1544_v57  ;;  %vm1543_vm2 = vcmp.eq.f32.partialorder %v1542_v54, 8.507059e+37 }
0x12c7   :  { %v1600_v49 = vadd.f32 %v2031_v21, %v1599_v31 }
0x12c9   :  { %v1604_v18 = vsel %vm1603_vm13, %v2031_v21, %v1600_v49 }
0x12ca   :  { %v2035_v44 = vpop.eup %2034  ;;  %v1609_v14 = vsel %vm1606_vm14, %v1608_v50, %v1604_v18 }
0x12cb   :  { %v1534_v45 = vmul.f32 %v2035_v44, %v1532_v22  ;;  %vm1539_vm15 = vweird.f32 %v2035_v44  ;;  %v1612_v15 = vmul.f32 %v1609_v14, %v2688_v42  ;;  %v1718_v22 = vld [vmem:[%s2768_s9 + $0x8] sm:$0xff]  ;;  %s1784_s9 = sshll.u32 %s2133_s15, 4  ;;  %s1785_s9 = int_to_ptr.vmem [resolvable:$true] %s1784_s9 }
0x12cc   :  { %vm1540_vm1 = vmor %vm1538_vm0, %vm1539_vm15  ;;  %1744 = vmatpush.msra.mxu2 %v1718_v22 }
0x12cd   :  { %v1535_v24 = vsub.f32 1.0, %v1534_v45 }
0x12ce   :  { %1745 = vmatpush.msra.mxu2 %v1717_v30 }
0x12cf   :  { %v1536_v60 = vmul.f32 %v2035_v44, %v1535_v24 }
0x12d1   :  { %v1537_v52 = vadd.f32 %v2035_v44, %v1536_v60 }
0x12d3   :  { %v1541_v26 = vsel %vm1540_vm1, %v2035_v44, %v1537_v52 }
0x12d4   :  { %v1546_v28 = vsel %vm1543_vm2, %v1545_v17, %v1541_v26 }
0x12d5   :  { %v1549_v34 = vmul.f32 %v1546_v28, %v2693_v58 }
0x1303   :  { %v1615_v53 = vpop.permute.xlu1 %1614 }
0x1304   :  { %v1617_v25 = vmul.f32 %v1615_v53, %v1609_v14 }
0x1306   :  { %1619 = vrot.lane.b32.xlu0 %v1617_v25, %s2130_s30 }
0x1311   :  { %v1552_v27 = vpop.permute.xlu2 %1551 }
0x1312   :  { %v1554_v29 = vmul.f32 %v1552_v27, %v1546_v28 }
0x1314   :  { %1556 = vrot.lane.b32.xlu1 %v1554_v29, %s2130_s30 }
0x1378   :  { %v1620_v16 = vpop.permute.xlu0 %1619 }
0x1379   :  { %v1622_v32 = vadd.f32 %v1620_v16, %v1612_v15 }
0x137b   :  { %2036 = vtanh.f32 %v1622_v32 }
0x1381   :  { %v2037_v33 = vpop.eup %2036 }
0x1382   :  { %1625 = vrot.lane.b32.xlu2 %v2037_v33, %s2131_s20 }
0x1386   :  { %v1557_v35 = vpop.permute.xlu1 %1556 }
0x1387   :  { %v1559_v36 = vadd.f32 %v1557_v35, %v1549_v34 }
0x1389   :  { %2038 = vtanh.f32 %v1559_v36 }
0x138f   :  { %v2039_v37 = vpop.eup %2038 }
0x1390   :  { %1562 = vrot.lane.b32.xlu0 %v2039_v37, %s2131_s20 }
0x13dc   :  { %v1626_v23 = vpop.permute.xlu2 %1625 }
0x13dd   :  { %v1628_v38 = vmul.f32 %v1626_v23, %v1609_v14 }
0x13df   :  { %1630 = vrot.lane.b32.xlu1 %v1628_v38, %s2130_s30 }
0x1402   :  { %v1563_v39 = vpop.permute.xlu0 %1562 }
0x1403   :  { %v1565_v40 = vmul.f32 %v1563_v39, %v1546_v28 }
0x1405   :  { %1655 = vrot.lane.b32.xlu2 %v1565_v40, %s2130_s30 }
0x1451   :  { %v1631_v41 = vpop.permute.xlu1 %1630 }
0x1452   :  { %1754 = vst.msk [vmem:[#allocation4] sm:$0x3] %vm1753_vm3, %v1631_v41  ;;  %1900 = vmatmul.msk.f32.vlgmr.msrb.gmra.mxu0 %vm162_vm9, %v1631_v41 }
0x145f   :  { %v1656_v42 = vpop.permute.xlu2 %1655 }
0x1460   :  { %1901 = vmatmul.msk.f32.vlgmr.msrb.gmra.mxu1 %vm162_vm9, %v1656_v42 }
0x14cf   :  { %v1651_v43 = vpop.f32.mrf.mxu0 }
0x14d0   :  { %v1652_v47 = vadd.f32 %v2707_v7, %v1651_v43 }
0x14dd   :  { %v1676_v55 = vpop.f32.mrf.mxu1 }
0x14de   :  { %v1679_v58 = vadd.f32 %v1676_v55, %v1652_v47 }
0x14e0   :  { %2040 = vtanh.f32 %v1679_v58  ;;  %v1902_v61 = vmul.f32 -1.442695, %v1679_v58 }
0x14e2   :  { %2042 = vpow2.f32 %v1902_v61 }
0x14e6   :  { %v2041_v59 = vpop.eup %2040 }
0x14e7   :  { %1702 = vrot.lane.b32.xlu0 %v2041_v59, %s2131_s20 }
0x14e8   :  { %v2043_v62 = vpop.eup %2042 }
0x14e9   :  { %v1683_v0 = vadd.f32 1.0, %v2043_v62 }
0x14eb   :  { %2044 = vrcp.f32 %v1683_v0  ;;  %v1695_v8 = vand.u32 2147483648, %v1683_v0  ;;  %vm1689_vm5 = vweird.f32 %v1683_v0  ;;  %v1693_v9 = vand.u32 2147483647, %v1683_v0 }
0x14ed   :  { %v1696_v11 = vor.u32 1.1754944e-38, %v1695_v8  ;;  %vm1694_vm7 = vcmp.eq.f32.partialorder %v1693_v9, 8.507059e+37 }
0x14f1   :  { %v2045_v1 = vpop.eup %2044 }
0x14f2   :  { %v1685_v46 = vmul.f32 %v2045_v1, %v1683_v0  ;;  %vm1690_vm4 = vweird.f32 %v2045_v1 }
0x14f3   :  { %vm1691_vm6 = vmor %vm1689_vm5, %vm1690_vm4 }
0x14f4   :  { %v1686_v3 = vsub.f32 1.0, %v1685_v46 }
0x14f6   :  { %v1687_v4 = vmul.f32 %v2045_v1, %v1686_v3 }
0x14f8   :  { %v1688_v5 = vadd.f32 %v2045_v1, %v1687_v4 }
0x14fa   :  { %v1692_v7 = vsel %vm1691_vm6, %v2045_v1, %v1688_v5 }
0x14fb   :  { %v1697_v13 = vsel %vm1694_vm7, %v1696_v11, %v1692_v7 }
0x14fc   :  { %v1700_v20 = vmul.f32 %v1697_v13, %v1559_v36 }
0x1559   :  { %v1703_v10 = vpop.permute.xlu0 %1702 }
0x155a   :  { %v1705_v2 = vmul.f32 %v1703_v10, %v1697_v13 }
0x155c   :  { %1707 = vrot.lane.b32.xlu1 %v1705_v2, %s2130_s30 }
0x1564   :  { %1756 = vrot.lane.b32.xlu1 %v1622_v32, %s2132_s8 }
0x15ce   :  { %v1708_v19 = vpop.permute.xlu1 %1707 }
0x15cf   :  { %v1710_v12 = vadd.f32 %v1708_v19, %v1700_v20 }
0x15d1   :  { %2046 = vtanh.f32 %v1710_v12 }
0x15d6   :  { %v1757_v56 = vpop.permute.xlu1 %1756 }
0x15d7   :  { %v2047_v21 = vpop.eup %2046  ;;  %1759 = vst.msk [vmem:[#allocation6] sm:$0x3] %vm1753_vm3, %v1757_v56 }
0x15d8   :  { %1713 = vrot.lane.b32.xlu2 %v2047_v21, %s2131_s20 }
0x15e0   :  { %1764 = vrot.lane.b32.xlu2 %v1710_v12, %s2132_s8 }
0x1632   :  { %v1714_v31 = vpop.permute.xlu2 %1713 }
0x1633   :  { %v1716_v44 = vmul.f32 %v1714_v31, %v1697_v13 }
0x1635   :  { %1726 = vrot.lane.b32.xlu0 %v1716_v44, %s2130_s30 }
0x163a   :  { %v1765_v49 = vpop.permute.xlu2 %1764 }
0x163b   :  { %1768 = vst.msk [vmem:[#allocation6 + $0x2] sm:$0x3] %vm1753_vm3, %v1765_v49 }
0x16a7   :  { %v1727_v48 = vpop.permute.xlu0 %1726 }
0x16a8   :  { %1762 = vst.msk [vmem:[#allocation4 + $0x2] sm:$0x3] %vm1753_vm3, %v1727_v48  ;;  %1903 = vmatmul.msk.f32.vlgmr.msra.gmra.mxu2 %vm162_vm9, %v1727_v48  ;;  %vm1750_vm9 = vcmask 25600  }
0x16a9   :  { %1792 = dma.vmem_to_hbm [thread:$0]  %s1785_s9, 64, %s1787_s4, [#allocation5], %s2130_s30, %s2130_s30, %s2134_s16  }
0x16aa   :  { %1805 = dma.vmem_to_hbm [thread:$0]  %s1798_s5, 64, %s1800_s21, [#allocation5], %s2130_s30, %s2130_s30, %s2134_s16  }
0x172b   :  { %v1747_v45 = vpop.f32.mrf.mxu2 }
0x172c   :  { %v1748_v18 = vadd.f32 %v1919_v51, %v1747_v45 }
0x172e   :  { %1751 = vst.msk [vmem:[#allocation2] sm:$0x3] %vm1750_vm9, %v1748_v18 }
0x172f   :  { %1779 = dma.vmem_to_hbm [thread:$0]  %s1775_s1, 32, %s1777_s23, [#allocation3]  }
0x1730   :  { %2125 = dma.done.wait [#allocation3], 32  }
0x1731   :  { %2126 = vsyncadd [#allocation3], 4294967264 }
0x1732   :  { %2127 = dma.done.wait [#allocation5], 128  }
0x1733   :  { %2128 = vsyncadd [#allocation5], 4294967168 }
0x1734   :  { %1818 = vsyncpa [#allocation3], 1 }
0x1735   :  { %1819 = vsyncpa [#allocation5], 1 }

</bundles_post_ra>
